<compile_context>
chip_gen: v7x
topology: tpu7x:2x2x1
jax: 0.10.0
libtpu: 0.0.40
codegen_flags: <defaults>
</compile_context>

<pallas_src>
import functools

import jax
import jax.numpy as jnp
import numpy as np
from jax import lax
from jax.experimental import pallas as pl
from jax.experimental.pallas import tpu as pltpu


# ----------------------------------------------------------------- kernel ---

def fused_attention_kernel(x_ref, wqkv_ref, wproj_ref, bproj_ref, o_ref,
                           qkv_ref, ctx_ref, *, num_heads):
    """One grid step = `bb` batch elements, fully fused QKV -> MHSA -> proj.

    x_ref     : (bb, N, C)    bf16  per-step activation tile
    wqkv_ref  : (C, 3C)       bf16  resident; softmax scale pre-folded into Q cols
    wproj_ref : (C, C)        bf16  resident
    bproj_ref : (1, C)        f32   resident
    o_ref     : (bb, N, C)    bf16  lane-dense output slab
    qkv_ref   : (bb*N, 3C)    bf16  VMEM scratch (QKV activations)
    ctx_ref   : (bb*N, C)     bf16  VMEM scratch (head-merged context)
    """
    BB, N, C = x_ref.shape
    D = C // num_heads
    M = BB * N

    # ---- QKV projection: one big MXU pass with M = bb*N rows ---------------
    x = x_ref[...].reshape(M, C)                                   # bf16
    qkv_ref[...] = jnp.dot(
        x, wqkv_ref[...], preferred_element_type=jnp.float32
    ).astype(qkv_ref.dtype)                                        # (M, 3C) bf16

    # ---- per-head attention, batched over the bb batch elements ------------
    for h in range(num_heads):
        # q already carries the softmax scale (folded into W_qkv columns).
        q = qkv_ref[:, h * D:(h + 1) * D].reshape(BB, N, D)        # bf16
        k = qkv_ref[:, C + h * D:C + (h + 1) * D].reshape(BB, N, D)
        v = qkv_ref[:, 2 * C + h * D:2 * C + (h + 1) * D].reshape(BB, N, D)

        # scores = q @ k^T, bf16 operands, f32 accumulation, batched over bb.
        s = lax.dot_general(q, k, (((2,), (2,)), ((0,), (0,))),
                            preferred_element_type=jnp.float32)    # (bb, N, N)

        # Max-stabilized softmax with deferred normalization.
        m = jnp.max(s, axis=-1, keepdims=True)
        p = jnp.exp(s - m)                                         # unnormalized
        denom = jnp.sum(p, axis=-1, keepdims=True)

        # attn_drop(p=0.0) is identity.
        o_h = lax.dot_general(p.astype(jnp.bfloat16), v,
                              (((2,), (1,)), ((0,), (0,))),
                              preferred_element_type=jnp.float32)  # (bb, N, D)
        # Normalize the (N, D) head output instead of the (N, N) probs;
        # reciprocal runs on the otherwise-idle EUP slot.
        o_h = o_h * pl.reciprocal(denom, approx=True)

        # Head-merge ((attn @ v).transpose(1, 2).reshape(B, N, C)) is a
        # column write into the (M, C) ctx scratch.
        ctx_ref[:, h * D:(h + 1) * D] = o_h.reshape(M, D).astype(ctx_ref.dtype)

    # ---- output projection, written lane-dense into (bb, N, C) -------------
    y = jnp.dot(ctx_ref[...], wproj_ref[...],
                preferred_element_type=jnp.float32) + bproj_ref[...]
    # proj_drop(p=0.0) is identity.
    o_ref[...] = y.reshape(BB, N, C).astype(o_ref.dtype)


# ---------------------------------------------------------------- wrapper ---

def _pick_batch_block(B, N):
    """Largest divisor of B such that bb*N roughly fills >=256 MXU rows.

    Falls back to 1 when N is not sublane-aligned (keeps the in-kernel
    (bb, N, C) <-> (bb*N, C) merges layout-preserving).
    """
    if N % 8 != 0:
        return 1
    bb = min(B, max(1, 256 // N))
    while B % bb:
        bb -= 1
    return max(bb, 1)


def attention_forward(x, w_qkv, w_proj, b_proj, num_heads):
    B, N, C = x.shape
    D = C // num_heads
    scale = float(D) ** -0.5

    bb = _pick_batch_block(B, N)

    # Fold the softmax scale into the Q columns of W_qkv (one-time cost,
    # amortized over the whole batch); removes the per-head scale in-kernel.
    w_qkv_scaled = jnp.concatenate([w_qkv[:, :C] * scale, w_qkv[:, C:]], axis=1)

    # bf16 matmul operands (MXU fast path, half the DMA/VMEM bytes); all
    # accumulation stays f32 inside the kernel.
    x_bf = x.astype(jnp.bfloat16)
    wqkv_bf = w_qkv_scaled.astype(jnp.bfloat16)
    wproj_bf = w_proj.astype(jnp.bfloat16)
    b2 = b_proj.reshape(1, C).astype(jnp.float32)

    kernel = functools.partial(fused_attention_kernel, num_heads=num_heads)
    M = bb * N

    return pl.pallas_call(
        kernel,
        out_shape=jax.ShapeDtypeStruct((B, N, C), jnp.bfloat16),
        grid=(B // bb,),
        in_specs=[
            pl.BlockSpec((bb, N, C), lambda b: (b, 0, 0)),     # x tile
            pl.BlockSpec((C, 3 * C), lambda b: (0, 0)),        # W_qkv (resident)
            pl.BlockSpec((C, C), lambda b: (0, 0)),            # W_proj (resident)
            pl.BlockSpec((1, C), lambda b: (0, 0)),            # b_proj (resident)
        ],
        out_specs=pl.BlockSpec((bb, N, C), lambda b: (b, 0, 0)),
        scratch_shapes=[
            pltpu.VMEM((M, 3 * C), jnp.bfloat16),              # qkv scratch
            pltpu.VMEM((M, C), jnp.bfloat16),                  # ctx scratch
        ],
        compiler_params=pltpu.CompilerParams(
            dimension_semantics=("parallel",),
        ),
    )(x_bf, wqkv_bf, wproj_bf, b2)


# -------------------------------------------------------- plain-JAX check ---

def attention_reference(x, w_qkv, w_proj, b_proj, num_heads):
    B, N, C = x.shape
    D = C // num_heads
    scale = float(D) ** -0.5
    qkv = (x @ w_qkv).reshape(B, N, 3, num_heads, D).transpose(2, 0, 3, 1, 4)
    q, k, v = qkv[0], qkv[1], qkv[2]
    attn = jnp.einsum("bhnd,bhmd->bhnm", q, k) * scale
    attn = jax.nn.softmax(attn, axis=-1)
    ctx = jnp.einsum("bhnm,bhmd->bhnd", attn, v)
    ctx = ctx.transpose(0, 2, 1, 3).reshape(B, N, C)
    return ctx @ w_proj + b_proj


# ------------------------------------------------------------------- main ---

if __name__ == "__main__":
    B, N, C, H = 2, 8, 32, 8          # batch, tokens, dim, num_heads (D = 4)

    key = jax.random.PRNGKey(0)
    kx, kqkv, kproj, kb = jax.random.split(key, 4)

    x = jax.random.normal(kx, (B, N, C), dtype=jnp.float32)
    # nn.Linear(dim, 3*dim, bias=False): applied as x @ W with W (C, 3C)
    w_qkv = jax.random.normal(kqkv, (C, 3 * C), dtype=jnp.float32) * 0.02
    # nn.Linear(dim, dim) with bias: W (C, C), b (C,)
    w_proj = jax.random.normal(kproj, (C, C), dtype=jnp.float32) * 0.02
    b_proj = jax.random.normal(kb, (C,), dtype=jnp.float32) * 0.02

    out = attention_forward(x, w_qkv, w_proj, b_proj, H)
    out = jax.block_until_ready(out)

    ref = attention_reference(x, w_qkv, w_proj, b_proj, H)
    assert out.shape == (B, N, C)
    # bf16 operands/scratch/output + approx reciprocal -> loosened tolerance.
    out_f32 = np.asarray(out.astype(jnp.float32))
    assert np.allclose(out_f32, np.asarray(ref), atol=5e-3, rtol=5e-2)

    print("KERNEL_OK")
</pallas_src>

<mosaic_0001>
module attributes {stable_mosaic.version = 11 : i64} {
  func.func @fused_attention_kernel(%arg0: i32, %arg1: memref<2x8x32xbf16, #tpu.memory_space<vmem>>, %arg2: memref<32x96xbf16, #tpu.memory_space<vmem>>, %arg3: memref<32x32xbf16, #tpu.memory_space<vmem>>, %arg4: memref<1x32xf32, #tpu.memory_space<vmem>>, %arg5: memref<2x8x32xbf16, #tpu.memory_space<vmem>>, %arg6: memref<16x96xbf16, #tpu.memory_space<vmem>>, %arg7: memref<16x32xbf16, #tpu.memory_space<vmem>>) attributes {dimension_semantics = [#tpu.dimension_semantics<parallel>], iteration_bounds = array<i64: 1>, scalar_prefetch = 0 : i64, scratch_operands = 2 : i64, tpu.core_type = #tpu.core_type<tc>, window_params = [{transform_indices = @transform_0, window_bounds = array<i64: 2, 8, 32>}, {pipeline_mode = #tpu.pipeline_mode<synchronous>, transform_indices = @transform_1, window_bounds = array<i64: 32, 96>}, {pipeline_mode = #tpu.pipeline_mode<synchronous>, transform_indices = @transform_2, window_bounds = array<i64: 32, 32>}, {pipeline_mode = #tpu.pipeline_mode<synchronous>, transform_indices = @transform_3, window_bounds = array<i64: 1, 32>}, {transform_indices = @transform_4, window_bounds = array<i64: 2, 8, 32>}]} {
    %c0 = arith.constant 0 : index
    %c0_0 = arith.constant 0 : index
    %c0_1 = arith.constant 0 : index
    %0 = vector.load %arg1[%c0, %c0_0, %c0_1] : memref<2x8x32xbf16, #tpu.memory_space<vmem>>, vector<2x8x32xbf16>
    %1 = vector.shape_cast %0 : vector<2x8x32xbf16> to vector<16x32xbf16>
    %c0_2 = arith.constant 0 : index
    %c0_3 = arith.constant 0 : index
    %2 = vector.load %arg2[%c0_2, %c0_3] : memref<32x96xbf16, #tpu.memory_space<vmem>>, vector<32x96xbf16>
    %cst = arith.constant dense<0.000000e+00> : vector<16x96xf32>
    %3 = tpu.matmul %1, %2, %cst {dimension_numbers = #tpu.dot_dimension_numbers<[1], [0], [0], [1], [0, 0, 1, 1], [], []>} : vector<16x32xbf16>, vector<32x96xbf16>, vector<16x96xf32> -> vector<16x96xf32>
    %4 = arith.truncf %3 : vector<16x96xf32> to vector<16x96xbf16>
    %c0_4 = arith.constant 0 : index
    %c0_5 = arith.constant 0 : index
    %5 = vector.load %arg6[%c0_4, %c0_5] : memref<16x96xbf16, #tpu.memory_space<vmem>>, vector<16x96xbf16>
    tpu.vector_store %arg6[%c0_4, %c0_5], %4 {strides = array<i32>} : memref<16x96xbf16, #tpu.memory_space<vmem>>, vector<16x96xbf16>,
    %c0_6 = arith.constant 0 : index
    %c0_7 = arith.constant 0 : index
    %6 = vector.load %arg6[%c0_6, %c0_7] : memref<16x96xbf16, #tpu.memory_space<vmem>>, vector<16x4xbf16>
    %7 = vector.shape_cast %6 : vector<16x4xbf16> to vector<2x8x4xbf16>
    %c0_8 = arith.constant 0 : index
    %c32 = arith.constant 32 : index
    %8 = vector.load %arg6[%c0_8, %c32] : memref<16x96xbf16, #tpu.memory_space<vmem>>, vector<16x4xbf16>
    %9 = vector.shape_cast %8 : vector<16x4xbf16> to vector<2x8x4xbf16>
    %c0_9 = arith.constant 0 : index
    %c64 = arith.constant 64 : index
    %10 = vector.load %arg6[%c0_9, %c64] : memref<16x96xbf16, #tpu.memory_space<vmem>>, vector<16x4xbf16>
    %11 = vector.shape_cast %10 : vector<16x4xbf16> to vector<2x8x4xbf16>
    %cst_10 = arith.constant dense<0.000000e+00> : vector<2x8x8xf32>
    %12 = tpu.matmul %7, %9, %cst_10 {dimension_numbers = #tpu.dot_dimension_numbers<[2], [2], [1], [1], [0, 0, 0, 1, 1, 1], [0], [0]>} : vector<2x8x4xbf16>, vector<2x8x4xbf16>, vector<2x8x8xf32> -> vector<2x8x8xf32>
    %cst_11 = arith.constant dense<0xFF800000> : vector<2x8xf32>
    %13 = vector.multi_reduction <maximumf>, %12, %cst_11 [2] : vector<2x8x8xf32> to vector<2x8xf32>
    %14 = vector.shape_cast %13 : vector<2x8xf32> to vector<2x8x1xf32>
    %15 = vector.broadcast %14 : vector<2x8x1xf32> to vector<2x8x8xf32>
    %16 = arith.subf %12, %15 : vector<2x8x8xf32>
    %17 = math.exp %16 : vector<2x8x8xf32>
    %cst_12 = arith.constant dense<0.000000e+00> : vector<2x8xf32>
    %18 = vector.multi_reduction <add>, %17, %cst_12 [2] : vector<2x8x8xf32> to vector<2x8xf32>
    %19 = vector.shape_cast %18 : vector<2x8xf32> to vector<2x8x1xf32>
    %20 = arith.truncf %17 : vector<2x8x8xf32> to vector<2x8x8xbf16>
    %cst_13 = arith.constant dense<0.000000e+00> : vector<2x8x4xf32>
    %21 = tpu.matmul %20, %11, %cst_13 {dimension_numbers = #tpu.dot_dimension_numbers<[2], [1], [1], [2], [0, 0, 0, 1, 1, 2], [0], [0]>} : vector<2x8x8xbf16>, vector<2x8x4xbf16>, vector<2x8x4xf32> -> vector<2x8x4xf32>
    %22 = tpu.reciprocal %19 {approx = true} : vector<2x8x1xf32> -> vector<2x8x1xf32>
    %23 = vector.broadcast %22 : vector<2x8x1xf32> to vector<2x8x4xf32>
    %24 = arith.mulf %21, %23 : vector<2x8x4xf32>
    %25 = vector.shape_cast %24 : vector<2x8x4xf32> to vector<16x4xf32>
    %26 = arith.truncf %25 : vector<16x4xf32> to vector<16x4xbf16>
    %c0_14 = arith.constant 0 : index
    %c0_15 = arith.constant 0 : index
    %27 = vector.load %arg7[%c0_14, %c0_15] : memref<16x32xbf16, #tpu.memory_space<vmem>>, vector<16x4xbf16>
    tpu.vector_store %arg7[%c0_14, %c0_15], %26 {strides = array<i32>} : memref<16x32xbf16, #tpu.memory_space<vmem>>, vector<16x4xbf16>,
    %c0_16 = arith.constant 0 : index
    %c4 = arith.constant 4 : index
    %28 = vector.load %arg6[%c0_16, %c4] : memref<16x96xbf16, #tpu.memory_space<vmem>>, vector<16x4xbf16>
    %29 = vector.shape_cast %28 : vector<16x4xbf16> to vector<2x8x4xbf16>
    %c0_17 = arith.constant 0 : index
    %c36 = arith.constant 36 : index
    %30 = vector.load %arg6[%c0_17, %c36] : memref<16x96xbf16, #tpu.memory_space<vmem>>, vector<16x4xbf16>
    %31 = vector.shape_cast %30 : vector<16x4xbf16> to vector<2x8x4xbf16>
    %c0_18 = arith.constant 0 : index
    %c68 = arith.constant 68 : index
    %32 = vector.load %arg6[%c0_18, %c68] : memref<16x96xbf16, #tpu.memory_space<vmem>>, vector<16x4xbf16>
    %33 = vector.shape_cast %32 : vector<16x4xbf16> to vector<2x8x4xbf16>
    %cst_19 = arith.constant dense<0.000000e+00> : vector<2x8x8xf32>
    %34 = tpu.matmul %29, %31, %cst_19 {dimension_numbers = #tpu.dot_dimension_numbers<[2], [2], [1], [1], [0, 0, 0, 1, 1, 1], [0], [0]>} : vector<2x8x4xbf16>, vector<2x8x4xbf16>, vector<2x8x8xf32> -> vector<2x8x8xf32>
    %cst_20 = arith.constant dense<0xFF800000> : vector<2x8xf32>
    %35 = vector.multi_reduction <maximumf>, %34, %cst_20 [2] : vector<2x8x8xf32> to vector<2x8xf32>
    %36 = vector.shape_cast %35 : vector<2x8xf32> to vector<2x8x1xf32>
    %37 = vector.broadcast %36 : vector<2x8x1xf32> to vector<2x8x8xf32>
    %38 = arith.subf %34, %37 : vector<2x8x8xf32>
    %39 = math.exp %38 : vector<2x8x8xf32>
    %cst_21 = arith.constant dense<0.000000e+00> : vector<2x8xf32>
    %40 = vector.multi_reduction <add>, %39, %cst_21 [2] : vector<2x8x8xf32> to vector<2x8xf32>
    %41 = vector.shape_cast %40 : vector<2x8xf32> to vector<2x8x1xf32>
    %42 = arith.truncf %39 : vector<2x8x8xf32> to vector<2x8x8xbf16>
    %cst_22 = arith.constant dense<0.000000e+00> : vector<2x8x4xf32>
    %43 = tpu.matmul %42, %33, %cst_22 {dimension_numbers = #tpu.dot_dimension_numbers<[2], [1], [1], [2], [0, 0, 0, 1, 1, 2], [0], [0]>} : vector<2x8x8xbf16>, vector<2x8x4xbf16>, vector<2x8x4xf32> -> vector<2x8x4xf32>
    %44 = tpu.reciprocal %41 {approx = true} : vector<2x8x1xf32> -> vector<2x8x1xf32>
    %45 = vector.broadcast %44 : vector<2x8x1xf32> to vector<2x8x4xf32>
    %46 = arith.mulf %43, %45 : vector<2x8x4xf32>
    %47 = vector.shape_cast %46 : vector<2x8x4xf32> to vector<16x4xf32>
    %48 = arith.truncf %47 : vector<16x4xf32> to vector<16x4xbf16>
    %c0_23 = arith.constant 0 : index
    %c4_24 = arith.constant 4 : index
    %49 = vector.load %arg7[%c0_23, %c4_24] : memref<16x32xbf16, #tpu.memory_space<vmem>>, vector<16x4xbf16>
    tpu.vector_store %arg7[%c0_23, %c4_24], %48 {strides = array<i32>} : memref<16x32xbf16, #tpu.memory_space<vmem>>, vector<16x4xbf16>,
    %c0_25 = arith.constant 0 : index
    %c8 = arith.constant 8 : index
    %50 = vector.load %arg6[%c0_25, %c8] : memref<16x96xbf16, #tpu.memory_space<vmem>>, vector<16x4xbf16>
    %51 = vector.shape_cast %50 : vector<16x4xbf16> to vector<2x8x4xbf16>
    %c0_26 = arith.constant 0 : index
    %c40 = arith.constant 40 : index
    %52 = vector.load %arg6[%c0_26, %c40] : memref<16x96xbf16, #tpu.memory_space<vmem>>, vector<16x4xbf16>
    %53 = vector.shape_cast %52 : vector<16x4xbf16> to vector<2x8x4xbf16>
    %c0_27 = arith.constant 0 : index
    %c72 = arith.constant 72 : index
    %54 = vector.load %arg6[%c0_27, %c72] : memref<16x96xbf16, #tpu.memory_space<vmem>>, vector<16x4xbf16>
    %55 = vector.shape_cast %54 : vector<16x4xbf16> to vector<2x8x4xbf16>
    %cst_28 = arith.constant dense<0.000000e+00> : vector<2x8x8xf32>
    %56 = tpu.matmul %51, %53, %cst_28 {dimension_numbers = #tpu.dot_dimension_numbers<[2], [2], [1], [1], [0, 0, 0, 1, 1, 1], [0], [0]>} : vector<2x8x4xbf16>, vector<2x8x4xbf16>, vector<2x8x8xf32> -> vector<2x8x8xf32>
    %cst_29 = arith.constant dense<0xFF800000> : vector<2x8xf32>
    %57 = vector.multi_reduction <maximumf>, %56, %cst_29 [2] : vector<2x8x8xf32> to vector<2x8xf32>
    %58 = vector.shape_cast %57 : vector<2x8xf32> to vector<2x8x1xf32>
    %59 = vector.broadcast %58 : vector<2x8x1xf32> to vector<2x8x8xf32>
    %60 = arith.subf %56, %59 : vector<2x8x8xf32>
    %61 = math.exp %60 : vector<2x8x8xf32>
    %cst_30 = arith.constant dense<0.000000e+00> : vector<2x8xf32>
    %62 = vector.multi_reduction <add>, %61, %cst_30 [2] : vector<2x8x8xf32> to vector<2x8xf32>
    %63 = vector.shape_cast %62 : vector<2x8xf32> to vector<2x8x1xf32>
    %64 = arith.truncf %61 : vector<2x8x8xf32> to vector<2x8x8xbf16>
    %cst_31 = arith.constant dense<0.000000e+00> : vector<2x8x4xf32>
    %65 = tpu.matmul %64, %55, %cst_31 {dimension_numbers = #tpu.dot_dimension_numbers<[2], [1], [1], [2], [0, 0, 0, 1, 1, 2], [0], [0]>} : vector<2x8x8xbf16>, vector<2x8x4xbf16>, vector<2x8x4xf32> -> vector<2x8x4xf32>
    %66 = tpu.reciprocal %63 {approx = true} : vector<2x8x1xf32> -> vector<2x8x1xf32>
    %67 = vector.broadcast %66 : vector<2x8x1xf32> to vector<2x8x4xf32>
    %68 = arith.mulf %65, %67 : vector<2x8x4xf32>
    %69 = vector.shape_cast %68 : vector<2x8x4xf32> to vector<16x4xf32>
    %70 = arith.truncf %69 : vector<16x4xf32> to vector<16x4xbf16>
    %c0_32 = arith.constant 0 : index
    %c8_33 = arith.constant 8 : index
    %71 = vector.load %arg7[%c0_32, %c8_33] : memref<16x32xbf16, #tpu.memory_space<vmem>>, vector<16x4xbf16>
    tpu.vector_store %arg7[%c0_32, %c8_33], %70 {strides = array<i32>} : memref<16x32xbf16, #tpu.memory_space<vmem>>, vector<16x4xbf16>,
    %c0_34 = arith.constant 0 : index
    %c12 = arith.constant 12 : index
    %72 = vector.load %arg6[%c0_34, %c12] : memref<16x96xbf16, #tpu.memory_space<vmem>>, vector<16x4xbf16>
    %73 = vector.shape_cast %72 : vector<16x4xbf16> to vector<2x8x4xbf16>
    %c0_35 = arith.constant 0 : index
    %c44 = arith.constant 44 : index
    %74 = vector.load %arg6[%c0_35, %c44] : memref<16x96xbf16, #tpu.memory_space<vmem>>, vector<16x4xbf16>
    %75 = vector.shape_cast %74 : vector<16x4xbf16> to vector<2x8x4xbf16>
    %c0_36 = arith.constant 0 : index
    %c76 = arith.constant 76 : index
    %76 = vector.load %arg6[%c0_36, %c76] : memref<16x96xbf16, #tpu.memory_space<vmem>>, vector<16x4xbf16>
    %77 = vector.shape_cast %76 : vector<16x4xbf16> to vector<2x8x4xbf16>
    %cst_37 = arith.constant dense<0.000000e+00> : vector<2x8x8xf32>
    %78 = tpu.matmul %73, %75, %cst_37 {dimension_numbers = #tpu.dot_dimension_numbers<[2], [2], [1], [1], [0, 0, 0, 1, 1, 1], [0], [0]>} : vector<2x8x4xbf16>, vector<2x8x4xbf16>, vector<2x8x8xf32> -> vector<2x8x8xf32>
    %cst_38 = arith.constant dense<0xFF800000> : vector<2x8xf32>
    %79 = vector.multi_reduction <maximumf>, %78, %cst_38 [2] : vector<2x8x8xf32> to vector<2x8xf32>
    %80 = vector.shape_cast %79 : vector<2x8xf32> to vector<2x8x1xf32>
    %81 = vector.broadcast %80 : vector<2x8x1xf32> to vector<2x8x8xf32>
    %82 = arith.subf %78, %81 : vector<2x8x8xf32>
    %83 = math.exp %82 : vector<2x8x8xf32>
    %cst_39 = arith.constant dense<0.000000e+00> : vector<2x8xf32>
    %84 = vector.multi_reduction <add>, %83, %cst_39 [2] : vector<2x8x8xf32> to vector<2x8xf32>
    %85 = vector.shape_cast %84 : vector<2x8xf32> to vector<2x8x1xf32>
    %86 = arith.truncf %83 : vector<2x8x8xf32> to vector<2x8x8xbf16>
    %cst_40 = arith.constant dense<0.000000e+00> : vector<2x8x4xf32>
    %87 = tpu.matmul %86, %77, %cst_40 {dimension_numbers = #tpu.dot_dimension_numbers<[2], [1], [1], [2], [0, 0, 0, 1, 1, 2], [0], [0]>} : vector<2x8x8xbf16>, vector<2x8x4xbf16>, vector<2x8x4xf32> -> vector<2x8x4xf32>
    %88 = tpu.reciprocal %85 {approx = true} : vector<2x8x1xf32> -> vector<2x8x1xf32>
    %89 = vector.broadcast %88 : vector<2x8x1xf32> to vector<2x8x4xf32>
    %90 = arith.mulf %87, %89 : vector<2x8x4xf32>
    %91 = vector.shape_cast %90 : vector<2x8x4xf32> to vector<16x4xf32>
    %92 = arith.truncf %91 : vector<16x4xf32> to vector<16x4xbf16>
    %c0_41 = arith.constant 0 : index
    %c12_42 = arith.constant 12 : index
    %93 = vector.load %arg7[%c0_41, %c12_42] : memref<16x32xbf16, #tpu.memory_space<vmem>>, vector<16x4xbf16>
    tpu.vector_store %arg7[%c0_41, %c12_42], %92 {strides = array<i32>} : memref<16x32xbf16, #tpu.memory_space<vmem>>, vector<16x4xbf16>,
    %c0_43 = arith.constant 0 : index
    %c16 = arith.constant 16 : index
    %94 = vector.load %arg6[%c0_43, %c16] : memref<16x96xbf16, #tpu.memory_space<vmem>>, vector<16x4xbf16>
    %95 = vector.shape_cast %94 : vector<16x4xbf16> to vector<2x8x4xbf16>
    %c0_44 = arith.constant 0 : index
    %c48 = arith.constant 48 : index
    %96 = vector.load %arg6[%c0_44, %c48] : memref<16x96xbf16, #tpu.memory_space<vmem>>, vector<16x4xbf16>
    %97 = vector.shape_cast %96 : vector<16x4xbf16> to vector<2x8x4xbf16>
    %c0_45 = arith.constant 0 : index
    %c80 = arith.constant 80 : index
    %98 = vector.load %arg6[%c0_45, %c80] : memref<16x96xbf16, #tpu.memory_space<vmem>>, vector<16x4xbf16>
    %99 = vector.shape_cast %98 : vector<16x4xbf16> to vector<2x8x4xbf16>
    %cst_46 = arith.constant dense<0.000000e+00> : vector<2x8x8xf32>
    %100 = tpu.matmul %95, %97, %cst_46 {dimension_numbers = #tpu.dot_dimension_numbers<[2], [2], [1], [1], [0, 0, 0, 1, 1, 1], [0], [0]>} : vector<2x8x4xbf16>, vector<2x8x4xbf16>, vector<2x8x8xf32> -> vector<2x8x8xf32>
    %cst_47 = arith.constant dense<0xFF800000> : vector<2x8xf32>
    %101 = vector.multi_reduction <maximumf>, %100, %cst_47 [2] : vector<2x8x8xf32> to vector<2x8xf32>
    %102 = vector.shape_cast %101 : vector<2x8xf32> to vector<2x8x1xf32>
    %103 = vector.broadcast %102 : vector<2x8x1xf32> to vector<2x8x8xf32>
    %104 = arith.subf %100, %103 : vector<2x8x8xf32>
    %105 = math.exp %104 : vector<2x8x8xf32>
    %cst_48 = arith.constant dense<0.000000e+00> : vector<2x8xf32>
    %106 = vector.multi_reduction <add>, %105, %cst_48 [2] : vector<2x8x8xf32> to vector<2x8xf32>
    %107 = vector.shape_cast %106 : vector<2x8xf32> to vector<2x8x1xf32>
    %108 = arith.truncf %105 : vector<2x8x8xf32> to vector<2x8x8xbf16>
    %cst_49 = arith.constant dense<0.000000e+00> : vector<2x8x4xf32>
    %109 = tpu.matmul %108, %99, %cst_49 {dimension_numbers = #tpu.dot_dimension_numbers<[2], [1], [1], [2], [0, 0, 0, 1, 1, 2], [0], [0]>} : vector<2x8x8xbf16>, vector<2x8x4xbf16>, vector<2x8x4xf32> -> vector<2x8x4xf32>
    %110 = tpu.reciprocal %107 {approx = true} : vector<2x8x1xf32> -> vector<2x8x1xf32>
    %111 = vector.broadcast %110 : vector<2x8x1xf32> to vector<2x8x4xf32>
    %112 = arith.mulf %109, %111 : vector<2x8x4xf32>
    %113 = vector.shape_cast %112 : vector<2x8x4xf32> to vector<16x4xf32>
    %114 = arith.truncf %113 : vector<16x4xf32> to vector<16x4xbf16>
    %c0_50 = arith.constant 0 : index
    %c16_51 = arith.constant 16 : index
    %115 = vector.load %arg7[%c0_50, %c16_51] : memref<16x32xbf16, #tpu.memory_space<vmem>>, vector<16x4xbf16>
    tpu.vector_store %arg7[%c0_50, %c16_51], %114 {strides = array<i32>} : memref<16x32xbf16, #tpu.memory_space<vmem>>, vector<16x4xbf16>,
    %c0_52 = arith.constant 0 : index
    %c20 = arith.constant 20 : index
    %116 = vector.load %arg6[%c0_52, %c20] : memref<16x96xbf16, #tpu.memory_space<vmem>>, vector<16x4xbf16>
    %117 = vector.shape_cast %116 : vector<16x4xbf16> to vector<2x8x4xbf16>
    %c0_53 = arith.constant 0 : index
    %c52 = arith.constant 52 : index
    %118 = vector.load %arg6[%c0_53, %c52] : memref<16x96xbf16, #tpu.memory_space<vmem>>, vector<16x4xbf16>
    %119 = vector.shape_cast %118 : vector<16x4xbf16> to vector<2x8x4xbf16>
    %c0_54 = arith.constant 0 : index
    %c84 = arith.constant 84 : index
    %120 = vector.load %arg6[%c0_54, %c84] : memref<16x96xbf16, #tpu.memory_space<vmem>>, vector<16x4xbf16>
    %121 = vector.shape_cast %120 : vector<16x4xbf16> to vector<2x8x4xbf16>
    %cst_55 = arith.constant dense<0.000000e+00> : vector<2x8x8xf32>
    %122 = tpu.matmul %117, %119, %cst_55 {dimension_numbers = #tpu.dot_dimension_numbers<[2], [2], [1], [1], [0, 0, 0, 1, 1, 1], [0], [0]>} : vector<2x8x4xbf16>, vector<2x8x4xbf16>, vector<2x8x8xf32> -> vector<2x8x8xf32>
    %cst_56 = arith.constant dense<0xFF800000> : vector<2x8xf32>
    %123 = vector.multi_reduction <maximumf>, %122, %cst_56 [2] : vector<2x8x8xf32> to vector<2x8xf32>
    %124 = vector.shape_cast %123 : vector<2x8xf32> to vector<2x8x1xf32>
    %125 = vector.broadcast %124 : vector<2x8x1xf32> to vector<2x8x8xf32>
    %126 = arith.subf %122, %125 : vector<2x8x8xf32>
    %127 = math.exp %126 : vector<2x8x8xf32>
    %cst_57 = arith.constant dense<0.000000e+00> : vector<2x8xf32>
    %128 = vector.multi_reduction <add>, %127, %cst_57 [2] : vector<2x8x8xf32> to vector<2x8xf32>
    %129 = vector.shape_cast %128 : vector<2x8xf32> to vector<2x8x1xf32>
    %130 = arith.truncf %127 : vector<2x8x8xf32> to vector<2x8x8xbf16>
    %cst_58 = arith.constant dense<0.000000e+00> : vector<2x8x4xf32>
    %131 = tpu.matmul %130, %121, %cst_58 {dimension_numbers = #tpu.dot_dimension_numbers<[2], [1], [1], [2], [0, 0, 0, 1, 1, 2], [0], [0]>} : vector<2x8x8xbf16>, vector<2x8x4xbf16>, vector<2x8x4xf32> -> vector<2x8x4xf32>
    %132 = tpu.reciprocal %129 {approx = true} : vector<2x8x1xf32> -> vector<2x8x1xf32>
    %133 = vector.broadcast %132 : vector<2x8x1xf32> to vector<2x8x4xf32>
    %134 = arith.mulf %131, %133 : vector<2x8x4xf32>
    %135 = vector.shape_cast %134 : vector<2x8x4xf32> to vector<16x4xf32>
    %136 = arith.truncf %135 : vector<16x4xf32> to vector<16x4xbf16>
    %c0_59 = arith.constant 0 : index
    %c20_60 = arith.constant 20 : index
    %137 = vector.load %arg7[%c0_59, %c20_60] : memref<16x32xbf16, #tpu.memory_space<vmem>>, vector<16x4xbf16>
    tpu.vector_store %arg7[%c0_59, %c20_60], %136 {strides = array<i32>} : memref<16x32xbf16, #tpu.memory_space<vmem>>, vector<16x4xbf16>,
    %c0_61 = arith.constant 0 : index
    %c24 = arith.constant 24 : index
    %138 = vector.load %arg6[%c0_61, %c24] : memref<16x96xbf16, #tpu.memory_space<vmem>>, vector<16x4xbf16>
    %139 = vector.shape_cast %138 : vector<16x4xbf16> to vector<2x8x4xbf16>
    %c0_62 = arith.constant 0 : index
    %c56 = arith.constant 56 : index
    %140 = vector.load %arg6[%c0_62, %c56] : memref<16x96xbf16, #tpu.memory_space<vmem>>, vector<16x4xbf16>
    %141 = vector.shape_cast %140 : vector<16x4xbf16> to vector<2x8x4xbf16>
    %c0_63 = arith.constant 0 : index
    %c88 = arith.constant 88 : index
    %142 = vector.load %arg6[%c0_63, %c88] : memref<16x96xbf16, #tpu.memory_space<vmem>>, vector<16x4xbf16>
    %143 = vector.shape_cast %142 : vector<16x4xbf16> to vector<2x8x4xbf16>
    %cst_64 = arith.constant dense<0.000000e+00> : vector<2x8x8xf32>
    %144 = tpu.matmul %139, %141, %cst_64 {dimension_numbers = #tpu.dot_dimension_numbers<[2], [2], [1], [1], [0, 0, 0, 1, 1, 1], [0], [0]>} : vector<2x8x4xbf16>, vector<2x8x4xbf16>, vector<2x8x8xf32> -> vector<2x8x8xf32>
    %cst_65 = arith.constant dense<0xFF800000> : vector<2x8xf32>
    %145 = vector.multi_reduction <maximumf>, %144, %cst_65 [2] : vector<2x8x8xf32> to vector<2x8xf32>
    %146 = vector.shape_cast %145 : vector<2x8xf32> to vector<2x8x1xf32>
    %147 = vector.broadcast %146 : vector<2x8x1xf32> to vector<2x8x8xf32>
    %148 = arith.subf %144, %147 : vector<2x8x8xf32>
    %149 = math.exp %148 : vector<2x8x8xf32>
    %cst_66 = arith.constant dense<0.000000e+00> : vector<2x8xf32>
    %150 = vector.multi_reduction <add>, %149, %cst_66 [2] : vector<2x8x8xf32> to vector<2x8xf32>
    %151 = vector.shape_cast %150 : vector<2x8xf32> to vector<2x8x1xf32>
    %152 = arith.truncf %149 : vector<2x8x8xf32> to vector<2x8x8xbf16>
    %cst_67 = arith.constant dense<0.000000e+00> : vector<2x8x4xf32>
    %153 = tpu.matmul %152, %143, %cst_67 {dimension_numbers = #tpu.dot_dimension_numbers<[2], [1], [1], [2], [0, 0, 0, 1, 1, 2], [0], [0]>} : vector<2x8x8xbf16>, vector<2x8x4xbf16>, vector<2x8x4xf32> -> vector<2x8x4xf32>
    %154 = tpu.reciprocal %151 {approx = true} : vector<2x8x1xf32> -> vector<2x8x1xf32>
    %155 = vector.broadcast %154 : vector<2x8x1xf32> to vector<2x8x4xf32>
    %156 = arith.mulf %153, %155 : vector<2x8x4xf32>
    %157 = vector.shape_cast %156 : vector<2x8x4xf32> to vector<16x4xf32>
    %158 = arith.truncf %157 : vector<16x4xf32> to vector<16x4xbf16>
    %c0_68 = arith.constant 0 : index
    %c24_69 = arith.constant 24 : index
    %159 = vector.load %arg7[%c0_68, %c24_69] : memref<16x32xbf16, #tpu.memory_space<vmem>>, vector<16x4xbf16>
    tpu.vector_store %arg7[%c0_68, %c24_69], %158 {strides = array<i32>} : memref<16x32xbf16, #tpu.memory_space<vmem>>, vector<16x4xbf16>,
    %c0_70 = arith.constant 0 : index
    %c28 = arith.constant 28 : index
    %160 = vector.load %arg6[%c0_70, %c28] : memref<16x96xbf16, #tpu.memory_space<vmem>>, vector<16x4xbf16>
    %161 = vector.shape_cast %160 : vector<16x4xbf16> to vector<2x8x4xbf16>
    %c0_71 = arith.constant 0 : index
    %c60 = arith.constant 60 : index
    %162 = vector.load %arg6[%c0_71, %c60] : memref<16x96xbf16, #tpu.memory_space<vmem>>, vector<16x4xbf16>
    %163 = vector.shape_cast %162 : vector<16x4xbf16> to vector<2x8x4xbf16>
    %c0_72 = arith.constant 0 : index
    %c92 = arith.constant 92 : index
    %164 = vector.load %arg6[%c0_72, %c92] : memref<16x96xbf16, #tpu.memory_space<vmem>>, vector<16x4xbf16>
    %165 = vector.shape_cast %164 : vector<16x4xbf16> to vector<2x8x4xbf16>
    %cst_73 = arith.constant dense<0.000000e+00> : vector<2x8x8xf32>
    %166 = tpu.matmul %161, %163, %cst_73 {dimension_numbers = #tpu.dot_dimension_numbers<[2], [2], [1], [1], [0, 0, 0, 1, 1, 1], [0], [0]>} : vector<2x8x4xbf16>, vector<2x8x4xbf16>, vector<2x8x8xf32> -> vector<2x8x8xf32>
    %cst_74 = arith.constant dense<0xFF800000> : vector<2x8xf32>
    %167 = vector.multi_reduction <maximumf>, %166, %cst_74 [2] : vector<2x8x8xf32> to vector<2x8xf32>
    %168 = vector.shape_cast %167 : vector<2x8xf32> to vector<2x8x1xf32>
    %169 = vector.broadcast %168 : vector<2x8x1xf32> to vector<2x8x8xf32>
    %170 = arith.subf %166, %169 : vector<2x8x8xf32>
    %171 = math.exp %170 : vector<2x8x8xf32>
    %cst_75 = arith.constant dense<0.000000e+00> : vector<2x8xf32>
    %172 = vector.multi_reduction <add>, %171, %cst_75 [2] : vector<2x8x8xf32> to vector<2x8xf32>
    %173 = vector.shape_cast %172 : vector<2x8xf32> to vector<2x8x1xf32>
    %174 = arith.truncf %171 : vector<2x8x8xf32> to vector<2x8x8xbf16>
    %cst_76 = arith.constant dense<0.000000e+00> : vector<2x8x4xf32>
    %175 = tpu.matmul %174, %165, %cst_76 {dimension_numbers = #tpu.dot_dimension_numbers<[2], [1], [1], [2], [0, 0, 0, 1, 1, 2], [0], [0]>} : vector<2x8x8xbf16>, vector<2x8x4xbf16>, vector<2x8x4xf32> -> vector<2x8x4xf32>
    %176 = tpu.reciprocal %173 {approx = true} : vector<2x8x1xf32> -> vector<2x8x1xf32>
    %177 = vector.broadcast %176 : vector<2x8x1xf32> to vector<2x8x4xf32>
    %178 = arith.mulf %175, %177 : vector<2x8x4xf32>
    %179 = vector.shape_cast %178 : vector<2x8x4xf32> to vector<16x4xf32>
    %180 = arith.truncf %179 : vector<16x4xf32> to vector<16x4xbf16>
    %c0_77 = arith.constant 0 : index
    %c28_78 = arith.constant 28 : index
    %181 = vector.load %arg7[%c0_77, %c28_78] : memref<16x32xbf16, #tpu.memory_space<vmem>>, vector<16x4xbf16>
    tpu.vector_store %arg7[%c0_77, %c28_78], %180 {strides = array<i32>} : memref<16x32xbf16, #tpu.memory_space<vmem>>, vector<16x4xbf16>,
    %c0_79 = arith.constant 0 : index
    %c0_80 = arith.constant 0 : index
    %182 = vector.load %arg7[%c0_79, %c0_80] : memref<16x32xbf16, #tpu.memory_space<vmem>>, vector<16x32xbf16>
    %c0_81 = arith.constant 0 : index
    %c0_82 = arith.constant 0 : index
    %183 = vector.load %arg3[%c0_81, %c0_82] : memref<32x32xbf16, #tpu.memory_space<vmem>>, vector<32x32xbf16>
    %cst_83 = arith.constant dense<0.000000e+00> : vector<16x32xf32>
    %184 = tpu.matmul %182, %183, %cst_83 {dimension_numbers = #tpu.dot_dimension_numbers<[1], [0], [0], [1], [0, 0, 1, 1], [], []>} : vector<16x32xbf16>, vector<32x32xbf16>, vector<16x32xf32> -> vector<16x32xf32>
    %c0_84 = arith.constant 0 : index
    %c0_85 = arith.constant 0 : index
    %185 = vector.load %arg4[%c0_84, %c0_85] : memref<1x32xf32, #tpu.memory_space<vmem>>, vector<1x32xf32>
    %186 = vector.broadcast %185 : vector<1x32xf32> to vector<16x32xf32>
    %187 = arith.addf %184, %186 : vector<16x32xf32>
    %188 = vector.shape_cast %187 : vector<16x32xf32> to vector<2x8x32xf32>
    %189 = arith.truncf %188 : vector<2x8x32xf32> to vector<2x8x32xbf16>
    %c0_86 = arith.constant 0 : index
    %c0_87 = arith.constant 0 : index
    %c0_88 = arith.constant 0 : index
    %190 = vector.load %arg5[%c0_86, %c0_87, %c0_88] : memref<2x8x32xbf16, #tpu.memory_space<vmem>>, vector<2x8x32xbf16>
    tpu.vector_store %arg5[%c0_86, %c0_87, %c0_88], %189 {strides = array<i32>} : memref<2x8x32xbf16, #tpu.memory_space<vmem>>, vector<2x8x32xbf16>,
    return
  }
  func.func @transform_0(%arg0: i32) -> (i32, i32, i32) {
    %c0_i32 = arith.constant 0 : i32
    %c0_i32_0 = arith.constant 0 : i32
    %c0_i32_1 = arith.constant 0 : i32
    return %arg0, %c0_i32, %c0_i32_0 : i32, i32, i32
  }
  func.func @transform_1(%arg0: i32) -> (i32, i32) {
    %c0_i32 = arith.constant 0 : i32
    %c0_i32_0 = arith.constant 0 : i32
    %c0_i32_1 = arith.constant 0 : i32
    return %c0_i32, %c0_i32_0 : i32, i32
  }
  func.func @transform_2(%arg0: i32) -> (i32, i32) {
    %c0_i32 = arith.constant 0 : i32
    %c0_i32_0 = arith.constant 0 : i32
    %c0_i32_1 = arith.constant 0 : i32
    return %c0_i32, %c0_i32_0 : i32, i32
  }
  func.func @transform_3(%arg0: i32) -> (i32, i32) {
    %c0_i32 = arith.constant 0 : i32
    %c0_i32_0 = arith.constant 0 : i32
    %c0_i32_1 = arith.constant 0 : i32
    return %c0_i32, %c0_i32_0 : i32, i32
  }
  func.func @transform_4(%arg0: i32) -> (i32, i32, i32) {
    %c0_i32 = arith.constant 0 : i32
    %c0_i32_0 = arith.constant 0 : i32
    %c0_i32_1 = arith.constant 0 : i32
    return %arg0, %c0_i32, %c0_i32_0 : i32, i32, i32
  }
}

</mosaic_0001>

<bundles_post_ra>
// kernel: tpu_custom_call.1
= control target key start
LH: loop header
LB: loop body
LE: loop exit
PB: predicated region body
PF: predicated region fallthrough
CT: control target
= control target key end

     0   :  { %9 = vsyncpa [#allocation5], 0  ;;  %s3113_s0 = inlined_call_operand.hbm [shape: bf16[2,8,32], index: 0, kind: input, shape index: {}]   ;;  %s3114_s1 = inlined_call_operand.hbm [shape: bf16[32,96], index: 1, kind: input, shape index: {}]   ;;  %s3115_s2 = inlined_call_operand.hbm [shape: bf16[32,32], index: 2, kind: input, shape index: {}]   ;;  %s3116_s3 = inlined_call_operand.vmem [shape: f32[1,32], index: 3, kind: input, shape index: {}]   ;;  %s3117_s4 = inlined_call_operand.hbm [shape: bf16[2,8,32], index: 4, kind: output, shape index: {}]  }
   0x1   :  { %10 = vsyncpa [#allocation8], 0 }
   0x2   :  { %11 = vsyncpa [#allocation6], 0  ;;  %s2615_s15 = smov [#allocation7]   ;;  %s2616_s17 = smov [#allocation4]  }
   0x3   :  { %s29_s16 = sshll.u32 %s2615_s15, 4  ;;  %s17_s18 = sshll.u32 %s2616_s17, 4  ;;  %s30_s16 = int_to_ptr.vmem [resolvable:$true] %s29_s16  ;;  %s2676_s18 = int_to_ptr.vmem [resolvable:$true] %s17_s18 }
   0x4   :  { %s2521_s21 = scalar_lea.hbm %s3114_s1, 256 }
   0x5   :  { %p2522_p0 = scmp.ne.s32.totalorder %s3114_s1, %s2521_s21  ;;  %p2525_p1 = scmp.lt.u32.totalorder %s2521_s21, %s3114_s1 }
   0x7   :  { %p2527_p2 = pnand %p2525_p1, %p2522_p0 }
   0x9   :  { %2530 = shalt.err (!%p2527_p2)
}
   0xa   :  { %s2531_s26 = scalar_lea.vmem %s30_s16, 256  ;;  %p2536_p4 = scmp.lt.s32.totalorder %s30_s16, %s30_s16 }
   0xb   :  { %p2532_p3 = scmp.ne.s32.totalorder %s30_s16, %s2531_s26  ;;  %p2537_p5 = scmp.lt.s32.totalorder %s2531_s26, %s2531_s26 }
   0xd   :  { %p2538_p6 = por %p2537_p5, %p2536_p4 }
   0xf   :  { %p2539_p7 = pnand %p2538_p6, %p2532_p3 }
  0x11   :  { %2542 = shalt.err (!%p2539_p7)
}
  0x12   :  { %s2617_s27 = smov 64   ;;  %s2618_s28 = smov 4  }
  0x13   :  { %35 = dma.hbm_to_vmem [thread:$0]  %s3114_s1, 256, %s30_s16, [#allocation8], %s2617_s27, %s2617_s27, %s2618_s28  }
  0x14   :  { %s2543_s7 = scalar_lea.hbm %s3113_s0, 128 }
  0x15   :  { %p2544_p8 = scmp.ne.s32.totalorder %s3113_s0, %s2543_s7  ;;  %p2547_p9 = scmp.lt.u32.totalorder %s2543_s7, %s3113_s0 }
  0x17   :  { %p2549_p10 = pnand %p2547_p9, %p2544_p8 }
  0x19   :  { %2552 = shalt.err (!%p2549_p10)
}
  0x1a   :  { %s2553_s12 = scalar_lea.vmem %s2676_s18, 128  ;;  %p2558_p12 = scmp.lt.s32.totalorder %s2676_s18, %s2676_s18 }
  0x1b   :  { %p2554_p11 = scmp.ne.s32.totalorder %s2676_s18, %s2553_s12  ;;  %p2559_p13 = scmp.lt.s32.totalorder %s2553_s12, %s2553_s12 }
  0x1d   :  { %p2560_p0 = por %p2559_p13, %p2558_p12 }
  0x1f   :  { %p2561_p1 = pnand %p2560_p0, %p2554_p11 }
  0x21   :  { %2564 = shalt.err (!%p2561_p1)
}
  0x22   :  { %23 = dma.hbm_to_vmem [thread:$0]  %s3113_s0, 128, %s2676_s18, [#allocation5], %s2617_s27, %s2617_s27, %s2618_s28  }
  0x23   :  { %s2619_s14 = smov [#allocation9]   ;;  %s2565_s19 = scalar_lea.hbm %s3115_s2, 256 }
  0x24   :  { %s41_s15 = sshll.u32 %s2619_s14, 4  ;;  %p2566_p2 = scmp.ne.s32.totalorder %s3115_s2, %s2565_s19  ;;  %s42_s15 = int_to_ptr.vmem [resolvable:$true] %s41_s15 }
  0x25   :  { %p2569_p3 = scmp.lt.u32.totalorder %s2565_s19, %s3115_s2 }
  0x27   :  { %p2571_p4 = pnand %p2569_p3, %p2566_p2 }
  0x29   :  { %2574 = shalt.err (!%p2571_p4)
}
  0x2a   :  { %s2575_s24 = scalar_lea.vmem %s42_s15, 256  ;;  %p2580_p6 = scmp.lt.s32.totalorder %s42_s15, %s42_s15 }
  0x2b   :  { %p2576_p5 = scmp.ne.s32.totalorder %s42_s15, %s2575_s24  ;;  %p2581_p7 = scmp.lt.s32.totalorder %s2575_s24, %s2575_s24 }
  0x2d   :  { %p2582_p8 = por %p2581_p7, %p2580_p6 }
  0x2f   :  { %p2583_p9 = pnand %p2582_p8, %p2576_p5 }
  0x31   :  { %2586 = shalt.err (!%p2583_p9)
}
  0x32   :  { %47 = dma.hbm_to_vmem [thread:$0]  %s3115_s2, 256, %s42_s15, [#allocation8], %s2617_s27, %s2617_s27, %s2618_s28  }
  0x33   :  { %2609 = dma.done.wait [#allocation5], 128  }
  0x34   :  { %2610 = vsyncadd [#allocation5], 4294967168 }
  0x35   :  { %2611 = dma.done.wait [#allocation8], 512  }
  0x36   :  { %2612 = vsyncadd [#allocation8], 4294966784  ;;  %v2620_v0 = vmov 0.0   ;;  %vm2621_vm0 = vmmov 0   ;;  %v2450_v1 = vld [vmem:[#allocation7] sm:$0xff]   ;;  %v2451_v2 = vld [vmem:[#allocation7 + $0x8] sm:$0xff]  }
  0x37   :  { %2206 = vmatprep.subr.bf16.mxu0 %v2620_v0  ;;  %2210 = vmatprep.mubr.msk.bf16.mxu0 %vm2621_vm0, %v2620_v0  ;;  %v2452_v3 = vld [vmem:[#allocation4] sm:$0xff]   ;;  %vm83_vm1 = vcmask 261120   ;;  %vm129_vm2 = vcmask 785408   ;;  %s2622_s2 = smov 96   ;;  %s2623_s25 = smov 92   ;;  %vm139_vm3 = vcmask 31744  }
  0x38   :  { %2214 = vmatprep.subr.bf16.mxu1 %v2620_v0  ;;  %2216 = vmatprep.mubr.msk.bf16.mxu1 %vm2621_vm0, %v2620_v0  ;;  %s2624_s26 = smov 124   ;;  %s2625_s29 = smov 60   ;;  %vm260_vm4 = vcmask 1043456   ;;  %vm234_vm5 = vcmask 64512   ;;  %vm589_vm6 = vcmask 64544   ;;  %vm822_vm7 = vcmask 97344  }
  0x39   :  { %2207 = vmatpush3.bf16.msra.mxu0 %v2450_v1  ;;  %s2626_s30 = smov 88   ;;  %s2627_s5 = smov 120   ;;  %vm1055_vm8 = vcmask 130144   ;;  %vm1288_vm9 = vcmask 162944   ;;  %vm1521_vm10 = vcmask 195744   ;;  %vm1754_vm11 = vcmask 228544  }
  0x3a   :  { %2208 = vmatprep.subr.bf16.mxu0 %v2620_v0  ;;  %s2628_s6 = smov 56   ;;  %s2629_s7 = smov 84   ;;  %vm1987_vm12 = vcmask 261344   ;;  %vm2059_vm13 = vcmask 257024  }
  0x3b   :  { %s2630_s8 = smov 116   ;;  %s2631_s9 = smov 52  }
  0x3c   :  { %s2632_s10 = smov 80   ;;  %s2633_s11 = smov 112  }
  0x3d   :  { %2209 = vmatpush3.bf16.msra.mxu0 %v2451_v2  ;;  %s2634_s12 = smov 48   ;;  %s2635_s1 = smov 76  }
  0x3e   :  { %2220 = vmatprep.subr.bf16.mxu0 %v2620_v0  ;;  %s2636_s13 = smov 108   ;;  %s2637_s14 = smov 44  }
  0x3f   :  { %s2638_s15 = smov 72   ;;  %s2639_s16 = smov 104  }
  0x40   :  { %2211 = vmatmul.mubr.msk.bf16.vlgmr.msra.gmra.mrb[0].mxu0 %vm83_vm1, %v2452_v3  ;;  %s2640_s17 = smov 40   ;;  %s2641_s19 = smov 68  }
  0x41   :  { %2222 = vmatprep.mubr.msk.bf16.mxu0 %vm2621_vm0, %v2620_v0  ;;  %s2642_s20 = smov 100   ;;  %s2643_s21 = smov 36  }
  0x42   :  { %s2644_s22 = smov 8   ;;  %s2645_s23 = smov 12  }
  0x43   :  { %s2646_s24 = smov 16   ;;  %s2647_s0 = smov 20  }
  0x44   :  { %s2648_s18 = smov 24  }
 0x113   :  { %v121_v4 = vpop.f32.mrb[0].mxu0 }
 0x114   :  { %v2212_v5 = vpop.f32.mrb[1].mxu0 }
 0x115   :  { %v124_v6 = vpop.f32.mrb[2].mxu0 }
 0x116   :  { %v128_v7 = vpack.c.bf16 %v124_v6, %v121_v4  ;;  %v2213_v8 = vpop.f32.mrb[3].mxu0 }
 0x118   :  { %130 = vst.msk [vmem:[#allocation2] sm:$0xff] %vm129_vm2, %v128_v7 }
 0x11f   :  { %v131_v9 = vld [vmem:[#allocation2] sm:$0xff] }
 0x120   :  { %v2739_v10 = vcombine.low %v131_v9, %v131_v9  ;;  %v2742_v11 = vcombine.high %v131_v9, %v131_v9 }
 0x122   :  { %137 = vrot.lane.b32.xlu0 %v2739_v10, %s2622_s2 }
 0x126   :  { %186 = vrot.lane.b32.xlu0 %v2742_v11, %s2622_s2  ;;  %s2649_s2 = smov 28  }
 0x12a   :  { %255 = vrot.lane.b32.xlu0 %v2739_v10, %s2617_s27 }
 0x12e   :  { %365 = vrot.lane.b32.xlu0 %v2739_v10, %s2623_s25 }
 0x132   :  { %416 = vrot.lane.b32.xlu0 %v2742_v11, %s2623_s25 }
 0x136   :  { %363 = vrot.lane.b32.xlu0 %v2739_v10, %s2624_s26 }
 0x13a   :  { %414 = vrot.lane.b32.xlu0 %v2742_v11, %s2624_s26 }
 0x13e   :  { %484 = vrot.lane.b32.xlu0 %v2739_v10, %s2625_s29 }
 0x194   :  { %v138_v12 = vpop.permute.xlu0 %137 }
 0x195   :  { %v144_v13 = vsel %vm139_vm3, %v138_v12, 0 }
 0x196   :  { %2215 = vmatpush3.bf16.xpose.msra.mxu1 %v144_v13 }
 0x197   :  { %2226 = vmatprep.subr.bf16.mxu1 %v2620_v0 }
 0x198   :  { %v187_v14 = vpop.permute.xlu0 %186 }
 0x199   :  { %v192_v15 = vsel %vm139_vm3, %v187_v14, 0 }
 0x19a   :  { %2221 = vmatpush3.bf16.xpose.msra.mxu0 %v192_v15 }
 0x19b   :  { %2232 = vmatprep.subr.bf16.mxu0 %v2620_v0 }
 0x19c   :  { %v256_v16 = vpop.permute.xlu0 %255 }
 0x19d   :  { %v262_v17 = vsel %vm260_vm4, %v256_v16, 0  ;;  %2217 = vmatmul.mubr.msk.bf16.vlgmr.msra.gmra.mrb[0].mxu1 %vm139_vm3, %v2739_v10 }
 0x19e   :  { %2227 = vmatpush3.bf16.msra.mxu1 %v262_v17  ;;  %2228 = vmatprep.mubr.msk.bf16.mxu1 %vm2621_vm0, %v2620_v0 }
 0x19f   :  { %2238 = vmatprep.subr.bf16.mxu1 %v2620_v0 }
 0x1a0   :  { %v366_v28 = vpop.permute.xlu0 %365 }
 0x1a1   :  { %2223 = vmatmul.mubr.msk.bf16.vlgmr.msra.gmra.mrb[4].mxu0 %vm139_vm3, %v2742_v11  ;;  %v371_v42 = vsel %vm139_vm3, %v366_v28, 0 }
 0x1a2   :  { %2234 = vmatprep.mubr.msk.bf16.mxu0 %vm2621_vm0, %v2620_v0 }
 0x1a4   :  { %v417_v33 = vpop.permute.xlu0 %416 }
 0x1a5   :  { %v422_v45 = vsel %vm139_vm3, %v417_v33, 0 }
 0x1a8   :  { %v364_v38 = vpop.permute.xlu0 %363 }
 0x1ac   :  { %v415_v41 = vpop.permute.xlu0 %414 }
 0x1b0   :  { %v485_v46 = vpop.permute.xlu0 %484 }
 0x1b1   :  { %v490_v47 = vsel %vm260_vm4, %v485_v46, 0 }
 0x270   :  { %v180_v18 = vpop.f32.mrb[0].mxu1 }
 0x271   :  { %v2218_v19 = vpop.f32.mrb[1].mxu1  ;;  %v235_v20 = vsel %vm234_vm5, %v180_v18, -inf }
 0x272   :  { %236 = vmax.xlane.f32.xlu1 %v235_v20  ;;  %v183_v21 = vpop.f32.mrb[2].mxu1 }
 0x273   :  { %v2219_v22 = vpop.f32.mrb[3].mxu1 }
 0x274   :  { %v228_v23 = vpop.f32.mrb[4].mxu0 }
 0x275   :  { %v2224_v24 = vpop.f32.mrb[5].mxu0  ;;  %v238_v25 = vsel %vm234_vm5, %v228_v23, -inf }
 0x276   :  { %239 = vmax.xlane.f32.xlu1 %v238_v25  ;;  %v231_v26 = vpop.f32.mrb[6].mxu0 }
 0x277   :  { %v2225_v27 = vpop.f32.mrb[7].mxu0 }
 0x287   :  { %304 = vrot.lane.b32.xlu1 %v2742_v11, %s2617_s27 }
 0x28b   :  { %532 = vrot.lane.b32.xlu1 %v2742_v11, %s2625_s29  ;;  %s2650_s29 = smov [#allocation10]  }
 0x2ff   :  { %v237_v29 = vpop.xlane.xlu1 %236 }
 0x300   :  { %v241_v30 = vsub.f32 %v180_v18, %v237_v29 }
 0x302   :  { %v243_v31 = vmul.f32 1.442695, %v241_v30 }
 0x303   :  { %v240_v32 = vpop.xlane.xlu1 %239 }
 0x304   :  { %2457 = vpow2.f32 %v243_v31  ;;  %v242_v34 = vsub.f32 %v228_v23, %v240_v32 }
 0x306   :  { %v245_v35 = vmul.f32 1.442695, %v242_v34 }
 0x307   :  { %v305_v36 = vpop.permute.xlu1 %304 }
 0x308   :  { %2459 = vpow2.f32 %v245_v35  ;;  %v310_v37 = vsel %vm260_vm4, %v305_v36, 0 }
 0x309   :  { %2233 = vmatpush3.bf16.msra.mxu0 %v310_v37 }
 0x30a   :  { %2244 = vmatprep.subr.bf16.mxu0 %v2620_v0 }
 0x30b   :  { %v533_v48 = vpop.permute.xlu1 %532 }
 0x30c   :  { %v538_v49 = vsel %vm260_vm4, %v533_v48, 0 }
 0x30e   :  { %v2775_v39 = vpop.eup %2457 }
 0x30f   :  { %v253_v40 = vpack.c.bf16 %v2775_v39, %v2775_v39 }
 0x311   :  { %2229 = vmatmul.mubr.msk.bf16.vlgmr.msra.gmra.mrb[4].mxu1 %vm234_vm5, %v253_v40 }
 0x312   :  { %v2781_v43 = vpop.eup %2459  ;;  %2239 = vmatpush3.bf16.xpose.msra.mxu1 %v371_v42  ;;  %2240 = vmatprep.mubr.msk.bf16.mxu1 %vm2621_vm0, %v2620_v0 }
 0x313   :  { %v254_v44 = vpack.c.bf16 %v2781_v43, %v2781_v43  ;;  %2250 = vmatprep.subr.bf16.mxu1 %v2620_v0 }
 0x315   :  { %2235 = vmatmul.mubr.msk.bf16.vlgmr.msra.gmra.mrb[8].mxu0 %vm234_vm5, %v254_v44 }
 0x316   :  { %2245 = vmatpush3.bf16.xpose.msra.mxu0 %v422_v45  ;;  %2246 = vmatprep.mubr.msk.bf16.mxu0 %vm2621_vm0, %v2620_v0 }
 0x317   :  { %2256 = vmatprep.subr.bf16.mxu0 %v2620_v0 }
 0x319   :  { %2241 = vmatmul.mubr.msk.bf16.vlgmr.msra.gmra.mrb[8].mxu1 %vm139_vm3, %v364_v38 }
 0x31a   :  { %2251 = vmatpush3.bf16.msra.mxu1 %v490_v47  ;;  %2252 = vmatprep.mubr.msk.bf16.mxu1 %vm2621_vm0, %v2620_v0 }
 0x31b   :  { %2262 = vmatprep.subr.bf16.mxu1 %v2620_v0 }
 0x31d   :  { %2247 = vmatmul.mubr.msk.bf16.vlgmr.msra.gmra.mrb[12].mxu0 %vm139_vm3, %v415_v41 }
 0x31e   :  { %2257 = vmatpush3.bf16.msra.mxu0 %v538_v49  ;;  %2258 = vmatprep.mubr.msk.bf16.mxu0 %vm2621_vm0, %v2620_v0 }
 0x31f   :  { %2268 = vmatprep.subr.bf16.mxu0 %v2620_v0 }
 0x3e4   :  { %v2803_v50 = vpop.f32.mrb[4].mxu1 }
 0x3e5   :  { %v2230_v51 = vpop.f32.mrb[5].mxu1 }
 0x3e6   :  { %v301_v52 = vpop.f32.mrb[6].mxu1 }
 0x3e7   :  { %v2231_v53 = vpop.f32.mrb[7].mxu1 }
 0x3e8   :  { %v2805_v54 = vpop.f32.mrb[8].mxu0 }
 0x3e9   :  { %v2236_v55 = vpop.f32.mrb[9].mxu0 }
 0x3ea   :  { %v349_v56 = vpop.f32.mrb[10].mxu0 }
 0x3eb   :  { %v2237_v57 = vpop.f32.mrb[11].mxu0 }
 0x3ec   :  { %v407_v58 = vpop.f32.mrb[8].mxu1 }
 0x3ed   :  { %v2242_v59 = vpop.f32.mrb[9].mxu1  ;;  %v464_v60 = vsel %vm234_vm5, %v407_v58, -inf }
 0x3ee   :  { %v410_v61 = vpop.f32.mrb[10].mxu1  ;;  %465 = vmax.xlane.f32.xlu1 %v464_v60 }
 0x3ef   :  { %v2243_v62 = vpop.f32.mrb[11].mxu1 }
 0x3f0   :  { %v458_v63 = vpop.f32.mrb[12].mxu0 }
 0x3f1   :  { %v2248_v1 = vpop.f32.mrb[13].mxu0  ;;  %v467_v2 = vsel %vm234_vm5, %v458_v63, -inf }
 0x3f2   :  { %468 = vmax.xlane.f32.xlu0 %v467_v2  ;;  %v461_v3 = vpop.f32.mrb[14].mxu0 }
 0x3f3   :  { %v2249_v4 = vpop.f32.mrb[15].mxu0 }
 0x3ff   :  { %598 = vrot.lane.b32.xlu1 %v2739_v10, %s2626_s30 }
 0x403   :  { %596 = vrot.lane.b32.xlu1 %v2739_v10, %s2627_s5 }
 0x407   :  { %765 = vrot.lane.b32.xlu1 %v2742_v11, %s2628_s6 }
 0x408   :  { %649 = vrot.lane.b32.xlu0 %v2742_v11, %s2626_s30  ;;  %s2067_s30 = sshll.u32 %s2650_s29, 4  ;;  %s2068_s30 = int_to_ptr.vmem [resolvable:$true] %s2067_s30 }
 0x409   :  { %p2592_p11 = scmp.lt.s32.totalorder %s2068_s30, %s2068_s30 }
 0x40c   :  { %647 = vrot.lane.b32.xlu0 %v2742_v11, %s2627_s5  ;;  %s2587_s5 = scalar_lea.vmem %s2068_s30, 128 }
 0x40d   :  { %p2588_p10 = scmp.ne.s32.totalorder %s2068_s30, %s2587_s5  ;;  %p2593_p12 = scmp.lt.s32.totalorder %s2587_s5, %s2587_s5 }
 0x40f   :  { %p2594_p13 = por %p2593_p12, %p2592_p11 }
 0x410   :  { %717 = vrot.lane.b32.xlu0 %v2739_v10, %s2628_s6 }
 0x411   :  { %p2595_p0 = pnand %p2594_p13, %p2588_p10 }
 0x47b   :  { %v466_v5 = vpop.xlane.xlu1 %465 }
 0x47c   :  { %v470_v6 = vsub.f32 %v407_v58, %v466_v5 }
 0x47e   :  { %v472_v7 = vmul.f32 1.442695, %v470_v6 }
 0x47f   :  { %v469_v8 = vpop.xlane.xlu0 %468  ;;  %v599_v15 = vpop.permute.xlu1 %598 }
 0x480   :  { %2461 = vpow2.f32 %v472_v7  ;;  %v471_v9 = vsub.f32 %v458_v63, %v469_v8  ;;  %v604_v18 = vsel %vm139_vm3, %v599_v15, 0 }
 0x482   :  { %v474_v12 = vmul.f32 1.442695, %v471_v9 }
 0x483   :  { %v650_v13 = vpop.permute.xlu0 %649  ;;  %v597_v21 = vpop.permute.xlu1 %596 }
 0x484   :  { %2463 = vpow2.f32 %v474_v12  ;;  %v655_v22 = vsel %vm139_vm3, %v650_v13, 0 }
 0x487   :  { %v648_v17 = vpop.permute.xlu0 %647  ;;  %v766_v25 = vpop.permute.xlu1 %765 }
 0x488   :  { %v771_v26 = vsel %vm260_vm4, %v766_v25, 0 }
 0x48a   :  { %v2815_v14 = vpop.eup %2461 }
 0x48b   :  { %v482_v16 = vpack.c.bf16 %v2815_v14, %v2815_v14  ;;  %v718_v23 = vpop.permute.xlu0 %717 }
 0x48c   :  { %v723_v24 = vsel %vm260_vm4, %v718_v23, 0 }
 0x48d   :  { %2253 = vmatmul.mubr.msk.bf16.vlgmr.msra.gmra.mrb[12].mxu1 %vm234_vm5, %v482_v16 }
 0x48e   :  { %v2821_v19 = vpop.eup %2463  ;;  %2263 = vmatpush3.bf16.xpose.msra.mxu1 %v604_v18  ;;  %2264 = vmatprep.mubr.msk.bf16.mxu1 %vm2621_vm0, %v2620_v0 }
 0x48f   :  { %v483_v20 = vpack.c.bf16 %v2821_v19, %v2821_v19  ;;  %2274 = vmatprep.subr.bf16.mxu1 %v2620_v0 }
 0x491   :  { %2259 = vmatmul.mubr.msk.bf16.vlgmr.msra.gmra.mrb[16].mxu0 %vm234_vm5, %v483_v20 }
 0x492   :  { %2269 = vmatpush3.bf16.xpose.msra.mxu0 %v655_v22  ;;  %2270 = vmatprep.mubr.msk.bf16.mxu0 %vm2621_vm0, %v2620_v0 }
 0x493   :  { %2280 = vmatprep.subr.bf16.mxu0 %v2620_v0 }
 0x495   :  { %2265 = vmatmul.mubr.msk.bf16.vlgmr.msra.gmra.mrb[16].mxu1 %vm139_vm3, %v597_v21 }
 0x496   :  { %2275 = vmatpush3.bf16.msra.mxu1 %v723_v24  ;;  %2276 = vmatprep.mubr.msk.bf16.mxu1 %vm2621_vm0, %v2620_v0 }
 0x497   :  { %2286 = vmatprep.subr.bf16.mxu1 %v2620_v0 }
 0x499   :  { %2271 = vmatmul.mubr.msk.bf16.vlgmr.msra.gmra.mrb[20].mxu0 %vm139_vm3, %v648_v17 }
 0x49a   :  { %2281 = vmatpush3.bf16.msra.mxu0 %v771_v26  ;;  %2282 = vmatprep.mubr.msk.bf16.mxu0 %vm2621_vm0, %v2620_v0 }
 0x49b   :  { %2292 = vmatprep.subr.bf16.mxu0 %v2620_v0 }
 0x560   :  { %v2843_v27 = vpop.f32.mrb[12].mxu1 }
 0x561   :  { %v2254_v28 = vpop.f32.mrb[13].mxu1 }
 0x562   :  { %v529_v29 = vpop.f32.mrb[14].mxu1 }
 0x563   :  { %v2255_v30 = vpop.f32.mrb[15].mxu1 }
 0x564   :  { %v2845_v31 = vpop.f32.mrb[16].mxu0 }
 0x565   :  { %v2260_v32 = vpop.f32.mrb[17].mxu0 }
 0x566   :  { %v577_v33 = vpop.f32.mrb[18].mxu0 }
 0x567   :  { %v2261_v34 = vpop.f32.mrb[19].mxu0 }
 0x568   :  { %v640_v35 = vpop.f32.mrb[16].mxu1 }
 0x569   :  { %v2266_v36 = vpop.f32.mrb[17].mxu1  ;;  %v697_v37 = vsel %vm234_vm5, %v640_v35, -inf }
 0x56a   :  { %698 = vmax.xlane.f32.xlu1 %v697_v37  ;;  %v643_v38 = vpop.f32.mrb[18].mxu1 }
 0x56b   :  { %v2267_v40 = vpop.f32.mrb[19].mxu1 }
 0x56c   :  { %v691_v41 = vpop.f32.mrb[20].mxu0 }
 0x56d   :  { %v2272_v42 = vpop.f32.mrb[21].mxu0  ;;  %v700_v44 = vsel %vm234_vm5, %v691_v41, -inf }
 0x56e   :  { %701 = vmax.xlane.f32.xlu0 %v700_v44  ;;  %v694_v45 = vpop.f32.mrb[22].mxu0 }
 0x56f   :  { %v2273_v46 = vpop.f32.mrb[23].mxu0 }
 0x57b   :  { %831 = vrot.lane.b32.xlu1 %v2739_v10, %s2629_s7 }
 0x57f   :  { %829 = vrot.lane.b32.xlu1 %v2739_v10, %s2630_s8 }
 0x583   :  { %998 = vrot.lane.b32.xlu1 %v2742_v11, %s2631_s9 }
 0x584   :  { %882 = vrot.lane.b32.xlu0 %v2742_v11, %s2629_s7 }
 0x588   :  { %880 = vrot.lane.b32.xlu0 %v2742_v11, %s2630_s8 }
 0x58c   :  { %950 = vrot.lane.b32.xlu0 %v2739_v10, %s2631_s9 }
 0x5f7   :  { %v699_v47 = vpop.xlane.xlu1 %698 }
 0x5f8   :  { %v703_v48 = vsub.f32 %v640_v35, %v699_v47 }
 0x5fa   :  { %v705_v49 = vmul.f32 1.442695, %v703_v48 }
 0x5fb   :  { %v702_v51 = vpop.xlane.xlu0 %701  ;;  %v832_v57 = vpop.permute.xlu1 %831 }
 0x5fc   :  { %2465 = vpow2.f32 %v705_v49  ;;  %v704_v52 = vsub.f32 %v691_v41, %v702_v51  ;;  %v837_v60 = vsel %vm139_vm3, %v832_v57, 0 }
 0x5fe   :  { %v707_v53 = vmul.f32 1.442695, %v704_v52 }
 0x5ff   :  { %v883_v55 = vpop.permute.xlu0 %882  ;;  %v830_v63 = vpop.permute.xlu1 %829 }
 0x600   :  { %2467 = vpow2.f32 %v707_v53  ;;  %v888_v1 = vsel %vm139_vm3, %v883_v55, 0 }
 0x603   :  { %v881_v59 = vpop.permute.xlu0 %880  ;;  %v999_v4 = vpop.permute.xlu1 %998 }
 0x604   :  { %v1004_v5 = vsel %vm260_vm4, %v999_v4, 0 }
 0x606   :  { %v2855_v56 = vpop.eup %2465 }
 0x607   :  { %v715_v58 = vpack.c.bf16 %v2855_v56, %v2855_v56  ;;  %v951_v2 = vpop.permute.xlu0 %950 }
 0x608   :  { %v956_v3 = vsel %vm260_vm4, %v951_v2, 0 }
 0x609   :  { %2277 = vmatmul.mubr.msk.bf16.vlgmr.msra.gmra.mrb[20].mxu1 %vm234_vm5, %v715_v58 }
 0x60a   :  { %v2861_v61 = vpop.eup %2467  ;;  %2287 = vmatpush3.bf16.xpose.msra.mxu1 %v837_v60  ;;  %2288 = vmatprep.mubr.msk.bf16.mxu1 %vm2621_vm0, %v2620_v0 }
 0x60b   :  { %v716_v62 = vpack.c.bf16 %v2861_v61, %v2861_v61  ;;  %2298 = vmatprep.subr.bf16.mxu1 %v2620_v0 }
 0x60d   :  { %2283 = vmatmul.mubr.msk.bf16.vlgmr.msra.gmra.mrb[24].mxu0 %vm234_vm5, %v716_v62 }
 0x60e   :  { %2293 = vmatpush3.bf16.xpose.msra.mxu0 %v888_v1  ;;  %2294 = vmatprep.mubr.msk.bf16.mxu0 %vm2621_vm0, %v2620_v0 }
 0x60f   :  { %2304 = vmatprep.subr.bf16.mxu0 %v2620_v0 }
 0x611   :  { %2289 = vmatmul.mubr.msk.bf16.vlgmr.msra.gmra.mrb[24].mxu1 %vm139_vm3, %v830_v63 }
 0x612   :  { %2299 = vmatpush3.bf16.msra.mxu1 %v956_v3  ;;  %2300 = vmatprep.mubr.msk.bf16.mxu1 %vm2621_vm0, %v2620_v0 }
 0x613   :  { %2310 = vmatprep.subr.bf16.mxu1 %v2620_v0 }
 0x615   :  { %2295 = vmatmul.mubr.msk.bf16.vlgmr.msra.gmra.mrb[28].mxu0 %vm139_vm3, %v881_v59 }
 0x616   :  { %2305 = vmatpush3.bf16.msra.mxu0 %v1004_v5  ;;  %2306 = vmatprep.mubr.msk.bf16.mxu0 %vm2621_vm0, %v2620_v0 }
 0x617   :  { %2316 = vmatprep.subr.bf16.mxu0 %v2620_v0 }
 0x6dc   :  { %v2883_v6 = vpop.f32.mrb[20].mxu1 }
 0x6dd   :  { %v2278_v7 = vpop.f32.mrb[21].mxu1 }
 0x6de   :  { %v762_v8 = vpop.f32.mrb[22].mxu1 }
 0x6df   :  { %v2279_v9 = vpop.f32.mrb[23].mxu1 }
 0x6e0   :  { %v2885_v12 = vpop.f32.mrb[24].mxu0 }
 0x6e1   :  { %v2284_v13 = vpop.f32.mrb[25].mxu0 }
 0x6e2   :  { %v810_v15 = vpop.f32.mrb[26].mxu0 }
 0x6e3   :  { %v2285_v16 = vpop.f32.mrb[27].mxu0 }
 0x6e4   :  { %v873_v17 = vpop.f32.mrb[24].mxu1 }
 0x6e5   :  { %v2290_v18 = vpop.f32.mrb[25].mxu1  ;;  %v930_v20 = vsel %vm234_vm5, %v873_v17, -inf }
 0x6e6   :  { %931 = vmax.xlane.f32.xlu1 %v930_v20  ;;  %v876_v21 = vpop.f32.mrb[26].mxu1 }
 0x6e7   :  { %v2291_v22 = vpop.f32.mrb[27].mxu1 }
 0x6e8   :  { %v924_v23 = vpop.f32.mrb[28].mxu0 }
 0x6e9   :  { %v2296_v24 = vpop.f32.mrb[29].mxu0  ;;  %v933_v25 = vsel %vm234_vm5, %v924_v23, -inf }
 0x6ea   :  { %934 = vmax.xlane.f32.xlu0 %v933_v25  ;;  %v927_v26 = vpop.f32.mrb[30].mxu0 }
 0x6eb   :  { %v2297_v28 = vpop.f32.mrb[31].mxu0 }
 0x6f7   :  { %1064 = vrot.lane.b32.xlu1 %v2739_v10, %s2632_s10 }
 0x6fb   :  { %1062 = vrot.lane.b32.xlu1 %v2739_v10, %s2633_s11 }
 0x6ff   :  { %1231 = vrot.lane.b32.xlu1 %v2742_v11, %s2634_s12 }
 0x700   :  { %1115 = vrot.lane.b32.xlu0 %v2742_v11, %s2632_s10 }
 0x704   :  { %1113 = vrot.lane.b32.xlu0 %v2742_v11, %s2633_s11 }
 0x708   :  { %1183 = vrot.lane.b32.xlu0 %v2739_v10, %s2634_s12 }
 0x773   :  { %v932_v29 = vpop.xlane.xlu1 %931 }
 0x774   :  { %v936_v30 = vsub.f32 %v873_v17, %v932_v29 }
 0x776   :  { %v938_v32 = vmul.f32 1.442695, %v936_v30 }
 0x777   :  { %v935_v33 = vpop.xlane.xlu0 %934  ;;  %v1065_v38 = vpop.permute.xlu1 %1064 }
 0x778   :  { %2469 = vpow2.f32 %v938_v32  ;;  %v937_v34 = vsub.f32 %v924_v23, %v935_v33  ;;  %v1070_v42 = vsel %vm139_vm3, %v1065_v38, 0 }
 0x77a   :  { %v940_v35 = vmul.f32 1.442695, %v937_v34 }
 0x77b   :  { %v1116_v36 = vpop.permute.xlu0 %1115  ;;  %v1063_v46 = vpop.permute.xlu1 %1062 }
 0x77c   :  { %2471 = vpow2.f32 %v940_v35  ;;  %v1121_v47 = vsel %vm139_vm3, %v1116_v36, 0 }
 0x77f   :  { %v1114_v41 = vpop.permute.xlu0 %1113  ;;  %v1232_v51 = vpop.permute.xlu1 %1231 }
 0x780   :  { %v1237_v52 = vsel %vm260_vm4, %v1232_v51, 0 }
 0x782   :  { %v2895_v37 = vpop.eup %2469 }
 0x783   :  { %v948_v40 = vpack.c.bf16 %v2895_v37, %v2895_v37  ;;  %v1184_v48 = vpop.permute.xlu0 %1183 }
 0x784   :  { %v1189_v49 = vsel %vm260_vm4, %v1184_v48, 0 }
 0x785   :  { %2301 = vmatmul.mubr.msk.bf16.vlgmr.msra.gmra.mrb[28].mxu1 %vm234_vm5, %v948_v40 }
 0x786   :  { %v2901_v44 = vpop.eup %2471  ;;  %2311 = vmatpush3.bf16.xpose.msra.mxu1 %v1070_v42  ;;  %2312 = vmatprep.mubr.msk.bf16.mxu1 %vm2621_vm0, %v2620_v0 }
 0x787   :  { %v949_v45 = vpack.c.bf16 %v2901_v44, %v2901_v44  ;;  %2322 = vmatprep.subr.bf16.mxu1 %v2620_v0 }
 0x789   :  { %2307 = vmatmul.mubr.msk.bf16.vlgmr.msra.gmra.mrb[32].mxu0 %vm234_vm5, %v949_v45 }
 0x78a   :  { %2317 = vmatpush3.bf16.xpose.msra.mxu0 %v1121_v47  ;;  %2318 = vmatprep.mubr.msk.bf16.mxu0 %vm2621_vm0, %v2620_v0 }
 0x78b   :  { %2328 = vmatprep.subr.bf16.mxu0 %v2620_v0 }
 0x78d   :  { %2313 = vmatmul.mubr.msk.bf16.vlgmr.msra.gmra.mrb[32].mxu1 %vm139_vm3, %v1063_v46 }
 0x78e   :  { %2323 = vmatpush3.bf16.msra.mxu1 %v1189_v49  ;;  %2324 = vmatprep.mubr.msk.bf16.mxu1 %vm2621_vm0, %v2620_v0 }
 0x78f   :  { %2334 = vmatprep.subr.bf16.mxu1 %v2620_v0 }
 0x791   :  { %2319 = vmatmul.mubr.msk.bf16.vlgmr.msra.gmra.mrb[36].mxu0 %vm139_vm3, %v1114_v41 }
 0x792   :  { %2329 = vmatpush3.bf16.msra.mxu0 %v1237_v52  ;;  %2330 = vmatprep.mubr.msk.bf16.mxu0 %vm2621_vm0, %v2620_v0 }
 0x793   :  { %2340 = vmatprep.subr.bf16.mxu0 %v2620_v0 }
 0x858   :  { %v2923_v53 = vpop.f32.mrb[28].mxu1 }
 0x859   :  { %v2302_v55 = vpop.f32.mrb[29].mxu1 }
 0x85a   :  { %v995_v57 = vpop.f32.mrb[30].mxu1 }
 0x85b   :  { %v2303_v58 = vpop.f32.mrb[31].mxu1 }
 0x85c   :  { %v2925_v59 = vpop.f32.mrb[32].mxu0 }
 0x85d   :  { %v2308_v60 = vpop.f32.mrb[33].mxu0 }
 0x85e   :  { %v1043_v62 = vpop.f32.mrb[34].mxu0 }
 0x85f   :  { %v2309_v63 = vpop.f32.mrb[35].mxu0 }
 0x860   :  { %v1106_v1 = vpop.f32.mrb[32].mxu1 }
 0x861   :  { %v2314_v2 = vpop.f32.mrb[33].mxu1  ;;  %v1163_v3 = vsel %vm234_vm5, %v1106_v1, -inf }
 0x862   :  { %1164 = vmax.xlane.f32.xlu1 %v1163_v3  ;;  %v1109_v4 = vpop.f32.mrb[34].mxu1 }
 0x863   :  { %v2315_v5 = vpop.f32.mrb[35].mxu1 }
 0x864   :  { %v1157_v7 = vpop.f32.mrb[36].mxu0 }
 0x865   :  { %v2320_v8 = vpop.f32.mrb[37].mxu0  ;;  %v1166_v9 = vsel %vm234_vm5, %v1157_v7, -inf }
 0x866   :  { %1167 = vmax.xlane.f32.xlu0 %v1166_v9  ;;  %v1160_v13 = vpop.f32.mrb[38].mxu0 }
 0x867   :  { %v2321_v15 = vpop.f32.mrb[39].mxu0 }
 0x873   :  { %1297 = vrot.lane.b32.xlu1 %v2739_v10, %s2635_s1 }
 0x877   :  { %1295 = vrot.lane.b32.xlu1 %v2739_v10, %s2636_s13 }
 0x87b   :  { %1464 = vrot.lane.b32.xlu1 %v2742_v11, %s2637_s14 }
 0x87c   :  { %1348 = vrot.lane.b32.xlu0 %v2742_v11, %s2635_s1 }
 0x880   :  { %1346 = vrot.lane.b32.xlu0 %v2742_v11, %s2636_s13 }
 0x884   :  { %1416 = vrot.lane.b32.xlu0 %v2739_v10, %s2637_s14 }
 0x8ef   :  { %v1165_v16 = vpop.xlane.xlu1 %1164 }
 0x8f0   :  { %v1169_v17 = vsub.f32 %v1106_v1, %v1165_v16 }
 0x8f2   :  { %v1171_v18 = vmul.f32 1.442695, %v1169_v17 }
 0x8f3   :  { %v1168_v20 = vpop.xlane.xlu0 %1167  ;;  %v1298_v25 = vpop.permute.xlu1 %1297 }
 0x8f4   :  { %2473 = vpow2.f32 %v1171_v18  ;;  %v1170_v21 = vsub.f32 %v1157_v7, %v1168_v20  ;;  %v1303_v29 = vsel %vm139_vm3, %v1298_v25, 0 }
 0x8f6   :  { %v1173_v22 = vmul.f32 1.442695, %v1170_v21 }
 0x8f7   :  { %v1349_v23 = vpop.permute.xlu0 %1348  ;;  %v1296_v33 = vpop.permute.xlu1 %1295 }
 0x8f8   :  { %2475 = vpow2.f32 %v1173_v22  ;;  %v1354_v34 = vsel %vm139_vm3, %v1349_v23, 0 }
 0x8fb   :  { %v1347_v28 = vpop.permute.xlu0 %1346  ;;  %v1465_v38 = vpop.permute.xlu1 %1464 }
 0x8fc   :  { %v1470_v40 = vsel %vm260_vm4, %v1465_v38, 0 }
 0x8fe   :  { %v2935_v24 = vpop.eup %2473 }
 0x8ff   :  { %v1181_v26 = vpack.c.bf16 %v2935_v24, %v2935_v24  ;;  %v1417_v35 = vpop.permute.xlu0 %1416 }
 0x900   :  { %v1422_v36 = vsel %vm260_vm4, %v1417_v35, 0 }
 0x901   :  { %2325 = vmatmul.mubr.msk.bf16.vlgmr.msra.gmra.mrb[36].mxu1 %vm234_vm5, %v1181_v26 }
 0x902   :  { %v2941_v30 = vpop.eup %2475  ;;  %2335 = vmatpush3.bf16.xpose.msra.mxu1 %v1303_v29  ;;  %2336 = vmatprep.mubr.msk.bf16.mxu1 %vm2621_vm0, %v2620_v0 }
 0x903   :  { %v1182_v32 = vpack.c.bf16 %v2941_v30, %v2941_v30  ;;  %2346 = vmatprep.subr.bf16.mxu1 %v2620_v0 }
 0x905   :  { %2331 = vmatmul.mubr.msk.bf16.vlgmr.msra.gmra.mrb[40].mxu0 %vm234_vm5, %v1182_v32 }
 0x906   :  { %2341 = vmatpush3.bf16.xpose.msra.mxu0 %v1354_v34  ;;  %2342 = vmatprep.mubr.msk.bf16.mxu0 %vm2621_vm0, %v2620_v0 }
 0x907   :  { %2352 = vmatprep.subr.bf16.mxu0 %v2620_v0 }
 0x909   :  { %2337 = vmatmul.mubr.msk.bf16.vlgmr.msra.gmra.mrb[40].mxu1 %vm139_vm3, %v1296_v33 }
 0x90a   :  { %2347 = vmatpush3.bf16.msra.mxu1 %v1422_v36  ;;  %2348 = vmatprep.mubr.msk.bf16.mxu1 %vm2621_vm0, %v2620_v0 }
 0x90b   :  { %2358 = vmatprep.subr.bf16.mxu1 %v2620_v0 }
 0x90d   :  { %2343 = vmatmul.mubr.msk.bf16.vlgmr.msra.gmra.mrb[44].mxu0 %vm139_vm3, %v1347_v28 }
 0x90e   :  { %2353 = vmatpush3.bf16.msra.mxu0 %v1470_v40  ;;  %2354 = vmatprep.mubr.msk.bf16.mxu0 %vm2621_vm0, %v2620_v0 }
 0x90f   :  { %2364 = vmatprep.subr.bf16.mxu0 %v2620_v0 }
 0x9d4   :  { %v2963_v41 = vpop.f32.mrb[36].mxu1 }
 0x9d5   :  { %v2326_v42 = vpop.f32.mrb[37].mxu1 }
 0x9d6   :  { %v1228_v45 = vpop.f32.mrb[38].mxu1 }
 0x9d7   :  { %v2327_v46 = vpop.f32.mrb[39].mxu1 }
 0x9d8   :  { %v2965_v47 = vpop.f32.mrb[40].mxu0 }
 0x9d9   :  { %v2332_v48 = vpop.f32.mrb[41].mxu0 }
 0x9da   :  { %v1276_v49 = vpop.f32.mrb[42].mxu0 }
 0x9db   :  { %v2333_v51 = vpop.f32.mrb[43].mxu0 }
 0x9dc   :  { %v1339_v52 = vpop.f32.mrb[40].mxu1 }
 0x9dd   :  { %v2338_v55 = vpop.f32.mrb[41].mxu1  ;;  %v1396_v57 = vsel %vm234_vm5, %v1339_v52, -inf }
 0x9de   :  { %1397 = vmax.xlane.f32.xlu1 %v1396_v57  ;;  %v1342_v58 = vpop.f32.mrb[42].mxu1 }
 0x9df   :  { %v2339_v60 = vpop.f32.mrb[43].mxu1 }
 0x9e0   :  { %v1390_v62 = vpop.f32.mrb[44].mxu0 }
 0x9e1   :  { %v2344_v63 = vpop.f32.mrb[45].mxu0  ;;  %v1399_v1 = vsel %vm234_vm5, %v1390_v62, -inf }
 0x9e2   :  { %1400 = vmax.xlane.f32.xlu0 %v1399_v1  ;;  %v1393_v2 = vpop.f32.mrb[46].mxu0 }
 0x9e3   :  { %v2345_v3 = vpop.f32.mrb[47].mxu0 }
 0x9ef   :  { %1530 = vrot.lane.b32.xlu1 %v2739_v10, %s2638_s15 }
 0x9f3   :  { %1528 = vrot.lane.b32.xlu1 %v2739_v10, %s2639_s16 }
 0x9f7   :  { %1697 = vrot.lane.b32.xlu1 %v2742_v11, %s2640_s17 }
 0x9f8   :  { %1581 = vrot.lane.b32.xlu0 %v2742_v11, %s2638_s15 }
 0x9fc   :  { %1579 = vrot.lane.b32.xlu0 %v2742_v11, %s2639_s16 }
 0xa00   :  { %1649 = vrot.lane.b32.xlu0 %v2739_v10, %s2640_s17 }
 0xa6b   :  { %v1398_v4 = vpop.xlane.xlu1 %1397 }
 0xa6c   :  { %v1402_v5 = vsub.f32 %v1339_v52, %v1398_v4 }
 0xa6e   :  { %v1404_v7 = vmul.f32 1.442695, %v1402_v5 }
 0xa6f   :  { %v1401_v8 = vpop.xlane.xlu0 %1400  ;;  %v1531_v17 = vpop.permute.xlu1 %1530 }
 0xa70   :  { %2477 = vpow2.f32 %v1404_v7  ;;  %v1403_v9 = vsub.f32 %v1390_v62, %v1401_v8  ;;  %v1536_v21 = vsel %vm139_vm3, %v1531_v17, 0 }
 0xa72   :  { %v1406_v13 = vmul.f32 1.442695, %v1403_v9 }
 0xa73   :  { %v1582_v15 = vpop.permute.xlu0 %1581  ;;  %v1529_v25 = vpop.permute.xlu1 %1528 }
 0xa74   :  { %2479 = vpow2.f32 %v1406_v13  ;;  %v1587_v26 = vsel %vm139_vm3, %v1582_v15, 0 }
 0xa77   :  { %v1580_v20 = vpop.permute.xlu0 %1579  ;;  %v1698_v32 = vpop.permute.xlu1 %1697 }
 0xa78   :  { %v1703_v33 = vsel %vm260_vm4, %v1698_v32, 0 }
 0xa7a   :  { %v2975_v16 = vpop.eup %2477 }
 0xa7b   :  { %v1414_v18 = vpack.c.bf16 %v2975_v16, %v2975_v16  ;;  %v1650_v28 = vpop.permute.xlu0 %1649 }
 0xa7c   :  { %v1655_v29 = vsel %vm260_vm4, %v1650_v28, 0 }
 0xa7d   :  { %2349 = vmatmul.mubr.msk.bf16.vlgmr.msra.gmra.mrb[44].mxu1 %vm234_vm5, %v1414_v18 }
 0xa7e   :  { %v2981_v22 = vpop.eup %2479  ;;  %2359 = vmatpush3.bf16.xpose.msra.mxu1 %v1536_v21  ;;  %2360 = vmatprep.mubr.msk.bf16.mxu1 %vm2621_vm0, %v2620_v0 }
 0xa7f   :  { %v1415_v23 = vpack.c.bf16 %v2981_v22, %v2981_v22  ;;  %2370 = vmatprep.subr.bf16.mxu1 %v2620_v0 }
 0xa81   :  { %2355 = vmatmul.mubr.msk.bf16.vlgmr.msra.gmra.mrb[48].mxu0 %vm234_vm5, %v1415_v23 }
 0xa82   :  { %2365 = vmatpush3.bf16.xpose.msra.mxu0 %v1587_v26  ;;  %2366 = vmatprep.mubr.msk.bf16.mxu0 %vm2621_vm0, %v2620_v0 }
 0xa83   :  { %2376 = vmatprep.subr.bf16.mxu0 %v2620_v0 }
 0xa85   :  { %2361 = vmatmul.mubr.msk.bf16.vlgmr.msra.gmra.mrb[48].mxu1 %vm139_vm3, %v1529_v25 }
 0xa86   :  { %2371 = vmatpush3.bf16.msra.mxu1 %v1655_v29  ;;  %2372 = vmatprep.mubr.msk.bf16.mxu1 %vm2621_vm0, %v2620_v0 }
 0xa87   :  { %2382 = vmatprep.subr.bf16.mxu1 %v2620_v0 }
 0xa89   :  { %2367 = vmatmul.mubr.msk.bf16.vlgmr.msra.gmra.mrb[52].mxu0 %vm139_vm3, %v1580_v20 }
 0xa8a   :  { %2377 = vmatpush3.bf16.msra.mxu0 %v1703_v33  ;;  %2378 = vmatprep.mubr.msk.bf16.mxu0 %vm2621_vm0, %v2620_v0 }
 0xa8b   :  { %2388 = vmatprep.subr.bf16.mxu0 %v2620_v0 }
 0xb50   :  { %v3003_v34 = vpop.f32.mrb[44].mxu1 }
 0xb51   :  { %v2350_v35 = vpop.f32.mrb[45].mxu1 }
 0xb52   :  { %v1461_v36 = vpop.f32.mrb[46].mxu1 }
 0xb53   :  { %v2351_v38 = vpop.f32.mrb[47].mxu1 }
 0xb54   :  { %v3005_v40 = vpop.f32.mrb[48].mxu0 }
 0xb55   :  { %v2356_v42 = vpop.f32.mrb[49].mxu0 }
 0xb56   :  { %v1509_v45 = vpop.f32.mrb[50].mxu0 }
 0xb57   :  { %v2357_v46 = vpop.f32.mrb[51].mxu0 }
 0xb58   :  { %v1572_v48 = vpop.f32.mrb[48].mxu1 }
 0xb59   :  { %v2362_v49 = vpop.f32.mrb[49].mxu1  ;;  %v1629_v51 = vsel %vm234_vm5, %v1572_v48, -inf }
 0xb5a   :  { %1630 = vmax.xlane.f32.xlu1 %v1629_v51  ;;  %v1575_v52 = vpop.f32.mrb[50].mxu1 }
 0xb5b   :  { %v2363_v55 = vpop.f32.mrb[51].mxu1 }
 0xb5c   :  { %v1623_v57 = vpop.f32.mrb[52].mxu0 }
 0xb5d   :  { %v2368_v58 = vpop.f32.mrb[53].mxu0  ;;  %v1632_v60 = vsel %vm234_vm5, %v1623_v57, -inf }
 0xb5e   :  { %1633 = vmax.xlane.f32.xlu0 %v1632_v60  ;;  %v1626_v62 = vpop.f32.mrb[54].mxu0  ;;  %v476_v60 = vsel %vm234_vm5, %v2815_v14, 0.0  ;;  %v942_v14 = vsel %vm234_vm5, %v2895_v37, 0.0 }
 0xb5f   :  { %v2369_v63 = vpop.f32.mrb[55].mxu0  ;;  %v712_v62 = vsel %vm234_vm5, %v2861_v61, 0.0  ;;  %v1175_v61 = vsel %vm234_vm5, %v2935_v24, 0.0 }
 0xb60   :  { %v479_v63 = vsel %vm234_vm5, %v2821_v19, 0.0  ;;  %v1411_v19 = vsel %vm234_vm5, %v2981_v22, 0.0 }
 0xb6b   :  { %1763 = vrot.lane.b32.xlu1 %v2739_v10, %s2641_s19 }
 0xb6f   :  { %1761 = vrot.lane.b32.xlu1 %v2739_v10, %s2642_s20 }
 0xb74   :  { %1814 = vrot.lane.b32.xlu0 %v2742_v11, %s2641_s19 }
 0xb78   :  { %1812 = vrot.lane.b32.xlu0 %v2742_v11, %s2642_s20 }
 0xbe7   :  { %v1631_v1 = vpop.xlane.xlu1 %1630 }
 0xbe8   :  { %v1635_v2 = vsub.f32 %v1572_v48, %v1631_v1  ;;  %v945_v1 = vsel %vm234_vm5, %v2901_v44, 0.0  ;;  %v1408_v44 = vsel %vm234_vm5, %v2975_v16, 0.0 }
 0xbea   :  { %v1637_v3 = vmul.f32 1.442695, %v1635_v2 }
 0xbeb   :  { %v1634_v4 = vpop.xlane.xlu0 %1633  ;;  %v1764_v9 = vpop.permute.xlu1 %1763 }
 0xbec   :  { %2481 = vpow2.f32 %v1637_v3  ;;  %v1636_v5 = vsub.f32 %v1623_v57, %v1634_v4  ;;  %v1769_v15 = vsel %vm139_vm3, %v1764_v9, 0 }
 0xbee   :  { %v1639_v7 = vmul.f32 1.442695, %v1636_v5 }
 0xbef   :  { %v1815_v18 = vpop.permute.xlu0 %1814  ;;  %v1762_v23 = vpop.permute.xlu1 %1761 }
 0xbf0   :  { %2483 = vpow2.f32 %v1639_v7  ;;  %v1820_v21 = vsel %vm139_vm3, %v1815_v18, 0  ;;  %v247_v18 = vsel %vm234_vm5, %v2775_v39, 0.0 }
 0xbf3   :  { %v1813_v25 = vpop.permute.xlu0 %1812 }
 0xbf6   :  { %v3013_v8 = vpop.eup %2481 }
 0xbf7   :  { %v1647_v13 = vpack.c.bf16 %v3013_v8, %v3013_v8  ;;  %v1641_v37 = vsel %vm234_vm5, %v3013_v8, 0.0 }
 0xbf9   :  { %2373 = vmatmul.mubr.msk.bf16.vlgmr.msra.gmra.mrb[52].mxu1 %vm234_vm5, %v1647_v13 }
 0xbfa   :  { %v2484_v17 = vpop.eup %2483  ;;  %2383 = vmatpush3.bf16.xpose.msra.mxu1 %v1769_v15  ;;  %2384 = vmatprep.mubr.msk.bf16.mxu1 %vm2621_vm0, %v2620_v0 }
 0xbfb   :  { %v1648_v20 = vpack.c.bf16 %v2484_v17, %v2484_v17  ;;  %2394 = vmatprep.subr.bf16.mxu1 %v2620_v0 }
 0xbfd   :  { %2379 = vmatmul.mubr.msk.bf16.vlgmr.msra.gmra.mrb[56].mxu0 %vm234_vm5, %v1648_v20 }
 0xbfe   :  { %2389 = vmatpush3.bf16.xpose.msra.mxu0 %v1820_v21  ;;  %2390 = vmatprep.mubr.msk.bf16.mxu0 %vm2621_vm0, %v2620_v0 }
 0xbff   :  { %2400 = vmatprep.subr.bf16.mxu0 %v2620_v0 }
 0xc01   :  { %2385 = vmatmul.mubr.msk.bf16.vlgmr.msra.gmra.mrb[56].mxu1 %vm139_vm3, %v1762_v23  ;;  %v250_v23 = vsel %vm234_vm5, %v2781_v43, 0.0 }
 0xc02   :  { %2396 = vmatprep.mubr.msk.bf16.mxu1 %vm2621_vm0, %v2620_v0 }
 0xc05   :  { %2391 = vmatmul.mubr.msk.bf16.vlgmr.msra.gmra.mrb[60].mxu0 %vm139_vm3, %v1813_v25 }
 0xc06   :  { %2402 = vmatprep.mubr.msk.bf16.mxu0 %vm2621_vm0, %v2620_v0 }
 0xccc   :  { %v3033_v26 = vpop.f32.mrb[52].mxu1 }
 0xccd   :  { %v2374_v28 = vpop.f32.mrb[53].mxu1 }
 0xcce   :  { %v1694_v29 = vpop.f32.mrb[54].mxu1 }
 0xccf   :  { %v2375_v32 = vpop.f32.mrb[55].mxu1 }
 0xcd0   :  { %v3035_v33 = vpop.f32.mrb[56].mxu0 }
 0xcd1   :  { %v2380_v35 = vpop.f32.mrb[57].mxu0 }
 0xcd2   :  { %v1742_v36 = vpop.f32.mrb[58].mxu0 }
 0xcd3   :  { %v2381_v38 = vpop.f32.mrb[59].mxu0 }
 0xcd4   :  { %v1805_v42 = vpop.f32.mrb[56].mxu1 }
 0xcd5   :  { %v2386_v45 = vpop.f32.mrb[57].mxu1  ;;  %v1862_v46 = vsel %vm234_vm5, %v1805_v42, -inf }
 0xcd6   :  { %1863 = vmax.xlane.f32.xlu1 %v1862_v46  ;;  %v1808_v48 = vpop.f32.mrb[58].mxu1 }
 0xcd7   :  { %v2387_v49 = vpop.f32.mrb[59].mxu1 }
 0xcd8   :  { %v1856_v51 = vpop.f32.mrb[60].mxu0 }
 0xcd9   :  { %v2392_v52 = vpop.f32.mrb[61].mxu0  ;;  %v1865_v55 = vsel %vm234_vm5, %v1856_v51, -inf }
 0xcda   :  { %1866 = vmax.xlane.f32.xlu0 %v1865_v55  ;;  %v1859_v57 = vpop.f32.mrb[62].mxu0 }
 0xcdb   :  { %v2393_v58 = vpop.f32.mrb[63].mxu0 }
 0xce7   :  { %1930 = vrot.lane.b32.xlu1 %v2742_v11, %s2643_s21  ;;  %v709_v11 = vsel %vm234_vm5, %v2855_v56, 0.0  ;;  %v1644_v56 = vsel %vm234_vm5, %v2484_v17, 0.0 }
 0xcf0   :  { %1882 = vrot.lane.b32.xlu0 %v2739_v10, %s2643_s21  ;;  %v1178_v10 = vsel %vm234_vm5, %v2941_v30, 0.0 }
 0xd0b   :  { %477 = vadd.xlane.f32.xlu1 %v476_v60 }
 0xd0f   :  { %713 = vadd.xlane.f32.xlu1 %v712_v62  ;;  %480 = vadd.xlane.f32.xlu0 %v479_v63 }
 0xd13   :  { %946 = vadd.xlane.f32.xlu1 %v945_v1  ;;  %710 = vadd.xlane.f32.xlu0 %v709_v11 }
 0xd17   :  { %1179 = vadd.xlane.f32.xlu1 %v1178_v10  ;;  %943 = vadd.xlane.f32.xlu0 %v942_v14 }
 0xd1b   :  { %1412 = vadd.xlane.f32.xlu1 %v1411_v19  ;;  %1176 = vadd.xlane.f32.xlu0 %v1175_v61 }
 0xd1f   :  { %1645 = vadd.xlane.f32.xlu1 %v1644_v56  ;;  %1409 = vadd.xlane.f32.xlu0 %v1408_v44 }
 0xd23   :  { %1642 = vadd.xlane.f32.xlu0 %v1641_v37 }
 0xd63   :  { %v1864_v30 = vpop.xlane.xlu1 %1863 }
 0xd64   :  { %v1868_v2 = vsub.f32 %v1805_v42, %v1864_v30 }
 0xd66   :  { %v1870_v3 = vmul.f32 1.442695, %v1868_v2 }
 0xd67   :  { %v1931_v22 = vpop.permute.xlu1 %1930  ;;  %v1867_v4 = vpop.xlane.xlu0 %1866 }
 0xd68   :  { %2485 = vpow2.f32 %v1870_v3  ;;  %v1936_v24 = vsel %vm260_vm4, %v1931_v22, 0  ;;  %v1869_v5 = vsub.f32 %v1856_v51, %v1867_v4 }
 0xd69   :  { %2401 = vmatpush3.bf16.msra.mxu0 %v1936_v24 }
 0xd6a   :  { %v1872_v7 = vmul.f32 1.442695, %v1869_v5 }
 0xd6b   :  { %v1883_v9 = vpop.permute.xlu0 %1882 }
 0xd6c   :  { %2487 = vpow2.f32 %v1872_v7  ;;  %v1888_v16 = vsel %vm260_vm4, %v1883_v9, 0 }
 0xd6d   :  { %2395 = vmatpush3.bf16.msra.mxu1 %v1888_v16 }
 0xd6e   :  { %2406 = vmatprep.subr.bf16.mxu1 %v2620_v0 }
 0xd72   :  { %v2486_v8 = vpop.eup %2485 }
 0xd73   :  { %v1874_v13 = vsel %vm234_vm5, %v2486_v8, 0.0  ;;  %v1880_v15 = vpack.c.bf16 %v2486_v8, %v2486_v8 }
 0xd74   :  { %1875 = vadd.xlane.f32.xlu0 %v1874_v13 }
 0xd75   :  { %2397 = vmatmul.mubr.msk.bf16.vlgmr.msra.gmra.mrb[60].mxu1 %vm234_vm5, %v1880_v15 }
 0xd76   :  { %v2488_v17 = vpop.eup %2487  ;;  %2410 = vmatprep.mubr.msk.bf16.mxu1 %vm2621_vm0, %v2620_v0 }
 0xd77   :  { %v1877_v20 = vsel %vm234_vm5, %v2488_v17, 0.0  ;;  %v1881_v21 = vpack.c.bf16 %v2488_v17, %v2488_v17  ;;  %v2456_v17 = vld [vmem:[#allocation9 + $0x8] sm:$0xff]  }
 0xd78   :  { %248 = vadd.xlane.f32.xlu0 %v247_v18  ;;  %1878 = vadd.xlane.f32.xlu1 %v1877_v20 }
 0xd79   :  { %2403 = vmatmul.mubr.msk.bf16.vlgmr.msra.gmra.mrb[64].mxu0 %vm234_vm5, %v1881_v21 }
 0xd7c   :  { %251 = vadd.xlane.f32.xlu1 %v250_v23 }
 0xd98   :  { %v478_v25 = vpop.xlane.xlu1 %477 }
 0xd99   :  { %2489 = vrcp.f32 %v478_v25 }
 0xd9c   :  { %v714_v28 = vpop.xlane.xlu1 %713  ;;  %v481_v29 = vpop.xlane.xlu0 %480 }
 0xd9d   :  { %2491 = vrcp.f32 %v481_v29 }
 0xd9e   :  { %2493 = vrcp.f32 %v714_v28 }
 0xda0   :  { %v947_v32 = vpop.xlane.xlu1 %946  ;;  %v711_v35 = vpop.xlane.xlu0 %710 }
 0xda1   :  { %2495 = vrcp.f32 %v711_v35 }
 0xda2   :  { %2497 = vrcp.f32 %v947_v32 }
 0xda3   :  { %v2490_v38 = vpop.eup %2489 }
 0xda4   :  { %v1180_v39 = vpop.xlane.xlu1 %1179  ;;  %v944_v36 = vpop.xlane.xlu0 %943  ;;  %v582_v43 = vmul.f32 %v2490_v38, %v2843_v27 }
 0xda5   :  { %2499 = vrcp.f32 %v944_v36 }
 0xda6   :  { %2501 = vrcp.f32 %v1180_v39 }
 0xda7   :  { %v2492_v42 = vpop.eup %2491 }
 0xda8   :  { %v1413_v45 = vpop.xlane.xlu1 %1412  ;;  %v1177_v46 = vpop.xlane.xlu0 %1176  ;;  %v583_v48 = vmul.f32 %v2492_v42, %v2845_v31 }
 0xda9   :  { %v2494_v49 = vpop.eup %2493  ;;  %2503 = vrcp.f32 %v1177_v46  ;;  %v2132_v46 = vld [vmem:[%s3116_s3] ss:$0 sm:$0xff] }
 0xdaa   :  { %v584_v51 = vpack.c.bf16 %v583_v48, %v582_v43  ;;  %2505 = vrcp.f32 %v1413_v45  ;;  %v816_v60 = vmul.f32 %v2494_v49, %v2885_v12 }
 0xdab   :  { %v2496_v52 = vpop.eup %2495 }
 0xdac   :  { %v1646_v55 = vpop.xlane.xlu1 %1645  ;;  %v1410_v57 = vpop.xlane.xlu0 %1409  ;;  %586 = vrot.lane.b32.xlu0 %v584_v51, %s2618_s28  ;;  %v815_v58 = vmul.f32 %v2496_v52, %v2883_v6 }
 0xdad   :  { %v2498_v62 = vpop.eup %2497  ;;  %2507 = vrcp.f32 %v1410_v57 }
 0xdae   :  { %2509 = vrcp.f32 %v1646_v55  ;;  %v817_v63 = vpack.c.bf16 %v816_v60, %v815_v58  ;;  %v1049_v11 = vmul.f32 %v2498_v62, %v2925_v59 }
 0xdaf   :  { %v2500_v27 = vpop.eup %2499 }
 0xdb0   :  { %v1643_v1 = vpop.xlane.xlu0 %1642  ;;  %819 = vrot.lane.b32.xlu1 %v817_v63, %s2644_s22  ;;  %v1048_v31 = vmul.f32 %v2500_v27, %v2923_v53  ;;  %v2502_v10 = vpop.eup %2501 }
 0xdb1   :  { %2511 = vrcp.f32 %v1643_v1  ;;  %v1282_v12 = vmul.f32 %v2502_v10, %v2965_v47 }
 0xdb2   :  { %v1050_v14 = vpack.c.bf16 %v1049_v11, %v1048_v31 }
 0xdb3   :  { %v2504_v19 = vpop.eup %2503 }
 0xdb4   :  { %1052 = vrot.lane.b32.xlu1 %v1050_v14, %s2645_s23  ;;  %v1281_v6 = vmul.f32 %v2504_v19, %v2963_v41  ;;  %v2506_v61 = vpop.eup %2505 }
 0xdb5   :  { %v1515_v53 = vmul.f32 %v2506_v61, %v3005_v40 }
 0xdb6   :  { %v1283_v56 = vpack.c.bf16 %v1282_v12, %v1281_v6 }
 0xdb7   :  { %v2508_v44 = vpop.eup %2507 }
 0xdb8   :  { %v2510_v37 = vpop.eup %2509  ;;  %1285 = vrot.lane.b32.xlu0 %v1283_v56, %s2646_s24  ;;  %v1514_v30 = vmul.f32 %v2508_v44, %v3003_v34 }
 0xdb9   :  { %v1748_v22 = vmul.f32 %v2510_v37, %v3035_v33 }
 0xdba   :  { %v1516_v2 = vpack.c.bf16 %v1515_v53, %v1514_v30 }
 0xdbb   :  { %v2512_v59 = vpop.eup %2511 }
 0xdbc   :  { %v1747_v3 = vmul.f32 %v2512_v59, %v3033_v26  ;;  %1518 = vrot.lane.b32.xlu1 %v1516_v2, %s2647_s0 }
 0xdbe   :  { %v1749_v41 = vpack.c.bf16 %v1748_v22, %v1747_v3 }
 0xdc0   :  { %1751 = vrot.lane.b32.xlu0 %v1749_v41, %s2648_s18 }
 0xe01   :  { %v1876_v47 = vpop.xlane.xlu0 %1875 }
 0xe05   :  { %v1879_v4 = vpop.xlane.xlu1 %1878  ;;  %v249_v24 = vpop.xlane.xlu0 %248 }
 0xe06   :  { %2513 = vrcp.f32 %v249_v24 }
 0xe09   :  { %v252_v5 = vpop.xlane.xlu1 %251 }
 0xe0a   :  { %2515 = vrcp.f32 %v252_v5 }
 0xe0b   :  { %2517 = vrcp.f32 %v1876_v47 }
 0xe0c   :  { %2519 = vrcp.f32 %v1879_v4 }
 0xe10   :  { %v2514_v34 = vpop.eup %2513 }
 0xe11   :  { %v354_v40 = vmul.f32 %v2514_v34, %v2803_v50 }
 0xe14   :  { %v2516_v7 = vpop.eup %2515 }
 0xe15   :  { %v355_v9 = vmul.f32 %v2516_v7, %v2805_v54  ;;  %v2455_v54 = vld [vmem:[#allocation9] sm:$0xff]   ;;  %v2518_v23 = vpop.eup %2517 }
 0xe16   :  { %2407 = vmatpush3.bf16.msra.mxu1 %v2455_v54  ;;  %v2520_v28 = vpop.eup %2519 }
 0xe17   :  { %v356_v26 = vpack.c.bf16 %v355_v9, %v354_v40  ;;  %2408 = vmatprep.subr.bf16.mxu1 %v2620_v0 }
 0xe19   :  { %357 = vst.msk [vmem:[#allocation3] sm:$0xff] %vm139_vm3, %v356_v26 }
 0xe1a   :  { %2409 = vmatpush3.bf16.msra.mxu1 %v2456_v17 }
 0xe1e   :  { %v587_v33 = vpop.permute.xlu0 %586 }
 0xe1f   :  { %590 = vst.msk [vmem:[#allocation3] sm:$0xff] %vm589_vm6, %v587_v33 }
 0xe22   :  { %v820_v16 = vpop.permute.xlu1 %819 }
 0xe23   :  { %823 = vst.msk [vmem:[#allocation3] sm:$0xff] %vm822_vm7, %v820_v16 }
 0xe26   :  { %v1053_v8 = vpop.permute.xlu1 %1052 }
 0xe27   :  { %1056 = vst.msk [vmem:[#allocation3] sm:$0xff] %vm1055_vm8, %v1053_v8 }
 0xe2a   :  { %v1286_v13 = vpop.permute.xlu0 %1285 }
 0xe2b   :  { %1289 = vst.msk [vmem:[#allocation3] sm:$0xff] %vm1288_vm9, %v1286_v13 }
 0xe2e   :  { %v1519_v15 = vpop.permute.xlu1 %1518 }
 0xe2f   :  { %1522 = vst.msk [vmem:[#allocation3] sm:$0xff] %vm1521_vm10, %v1519_v15 }
 0xe32   :  { %v1752_v50 = vpop.permute.xlu0 %1751 }
 0xe33   :  { %1755 = vst.msk [vmem:[#allocation3] sm:$0xff] %vm1754_vm11, %v1752_v50 }
 0xe48   :  { %v1924_v18 = vpop.f32.mrb[60].mxu1 }
 0xe49   :  { %v2398_v20 = vpop.f32.mrb[61].mxu1  ;;  %v1980_v32 = vmul.f32 %v2518_v23, %v1924_v18 }
 0xe4a   :  { %v1927_v21 = vpop.f32.mrb[62].mxu1 }
 0xe4b   :  { %v2399_v25 = vpop.f32.mrb[63].mxu1 }
 0xe4c   :  { %v1972_v29 = vpop.f32.mrb[64].mxu0 }
 0xe4d   :  { %v1981_v35 = vmul.f32 %v2520_v28, %v1972_v29  ;;  %v2404_v39 = vpop.f32.mrb[65].mxu0 }
 0xe4e   :  { %v1975_v36 = vpop.f32.mrb[66].mxu0 }
 0xe4f   :  { %v1982_v38 = vpack.c.bf16 %v1981_v35, %v1980_v32  ;;  %v2405_v42 = vpop.f32.mrb[67].mxu0 }
 0xe51   :  { %1984 = vrot.lane.b32.xlu1 %v1982_v38, %s2649_s2 }
 0xec3   :  { %v1985_v45 = vpop.permute.xlu1 %1984 }
 0xec4   :  { %1988 = vst.msk [vmem:[#allocation3] sm:$0xff] %vm1987_vm12, %v1985_v45 }
 0xecb   :  { %v1989_v0 = vld [vmem:[#allocation3] sm:$0xff] }
 0xecc   :  { %2411 = vmatmul.mubr.msk.bf16.vlgmr.msra.gmra.mrb[64].mxu1 %vm83_vm1, %v1989_v0 }
 0xf9f   :  { %v2050_v43 = vpop.f32.mrb[64].mxu1 }
 0xfa0   :  { %v2051_v48 = vadd.f32 %v2132_v46, %v2050_v43  ;;  %v2412_v49 = vpop.f32.mrb[65].mxu1 }
 0xfa1   :  { %v2053_v51 = vpop.f32.mrb[66].mxu1 }
 0xfa2   :  { %v2057_v52 = vpack.c.bf16 %v2051_v48, %v2051_v48  ;;  %v2054_v55 = vadd.f32 %v2132_v46, %v2053_v51  ;;  %v2413_v57 = vpop.f32.mrb[67].mxu1 }
 0xfa4   :  { %v2058_v58 = vpack.c.bf16 %v2054_v55, %v2054_v55  ;;  %2060 = vst.msk [vmem:[#allocation10] sm:$0xf] %vm2059_vm13, %v2057_v52 }
 0xfa6   :  { %2061 = vst.msk [vmem:[#allocation10 + $0x4] sm:$0xf] %vm2059_vm13, %v2058_v58 }
 0xfa7   :  { %2598 = shalt.err (!%p2595_p0)
}
 0xfa8   :  { %s2599_s7 = scalar_lea.hbm %s3117_s4, 128 }
 0xfa9   :  { %p2600_p1 = scmp.ne.s32.totalorder %s3117_s4, %s2599_s7  ;;  %p2603_p2 = scmp.lt.u32.totalorder %s2599_s7, %s3117_s4 }
 0xfab   :  { %p2605_p3 = pnand %p2603_p2, %p2600_p1 }
 0xfad   :  { %2608 = shalt.err (!%p2605_p3)
}
 0xfae   :  { %2073 = dma.vmem_to_hbm [thread:$0]  %s2068_s30, 128, %s3117_s4, [#allocation6], %s2617_s27, %s2617_s27, %s2618_s28  }
 0xfaf   :  { %2613 = dma.done.wait [#allocation6], 128  }
 0xfb0   :  { %2614 = vsyncadd [#allocation6], 4294967168 }
 0xfb1   :  { %2077 = vsyncpa [#allocation5], 1 }
 0xfb2   :  { %2078 = vsyncpa [#allocation8], 1 }
 0xfb3   :  { %2079 = vsyncpa [#allocation6], 1 }

</bundles_post_ra>
